<compile_context>
chip_gen: v5e
topology: v5e:2x2
jax: 0.10.0
libtpu: 0.0.40
codegen_flags: <defaults>
</compile_context>

<pallas_src>
import functools
import math

import numpy as np
import jax
import jax.numpy as jnp
from jax import lax
from jax.experimental import pallas as pl
from jax.experimental.pallas import tpu as pltpu

# ---------------- small config consistent with the module --------------------
BATCH = 2
SEQ = 8
NUM_HEADS = 8                      # must be divisible by mp_num = 8
HEAD_DIM = 8
HIDDEN = NUM_HEADS * HEAD_DIM      # 64
ROTARY_DIM = 4                     # config.rotary_dim (even, <= HEAD_DIM)
MP_NUM = 8
MASKED_BIAS = -1e9


# ---------------- fused Pallas kernel -----------------------------------------
def fused_block_kernel(x_ref, w5_ref, mmask_ref, route_ref, bias_ref,
                       lane_ref, hsel_ref, collapse_ref, o_ref, *,
                       num_heads, head_dim):
    hd = head_dim
    x = x_ref[...]                                                        # (R, D)

    # 1) Fused projection: columns [Q/s | V | K | rot(Q)/s | rot(K)] in ONE push
    #    (rotate_every_two and 1/sqrt(head_dim) folded into the weight).
    qkv5 = jnp.dot(x, w5_ref[...], preferred_element_type=jnp.float32)   # (R, 5D)

    # 2) Stack heads along rows: replicate the projection rows H times, apply
    #    the fused head-select * cos/sin mask, then ONE routing matmul that
    #    simultaneously does the RoPE combine (q*cos + rot(q)*sin, ditto k)
    #    and packs [q_f | k_f | v] per stacked row.
    rep = jnp.concatenate([qkv5] * num_heads, axis=0)                     # (S, 5D)
    sel = jnp.dot(rep * mmask_ref[...], route_ref[...],
                  preferred_element_type=jnp.float32)                     # (S, 3*hd)
    q_f = sel[:, 0 * hd:1 * hd]
    k_f = sel[:, 1 * hd:2 * hd]
    v_s = sel[:, 2 * hd:3 * hd]

    # 3) ONE score matmul for all (batch, head) blocks; off-diagonal blocks are
    #    killed by the precomputed block-diagonal causal bias.
    s = lax.dot_general(q_f, k_f, (((1,), (1,)), ((), ())),
                        preferred_element_type=jnp.float32)               # (S, S)
    s = s + bias_ref[...]

    # 4) ONE softmax (exact division, per review correctness note).
    m = jnp.max(s, axis=-1, keepdims=True)
    p = jnp.exp(s - m)
    p = p / jnp.sum(p, axis=-1, keepdims=True)

    # 5) ONE PV matmul.
    out_s = jnp.dot(p, v_s, preferred_element_type=jnp.float32)           # (S, hd)

    # 6) Un-stack back to (R, D) head-major lanes via constant selector matmuls
    #    (lane-expand, head mask, head-sum collapse).
    xbig = jnp.dot(out_s, lane_ref[...],
                   preferred_element_type=jnp.float32) * hsel_ref[...]    # (S, D)
    attn = jnp.dot(collapse_ref[...], xbig,
                   preferred_element_type=jnp.float32)                    # (R, D)

    # 7) attn_output + hidden_states + residual  ==  attn + 2*x
    o_ref[...] = attn + 2.0 * x


# ---------------- constant builders (wrapper-side layout plumbing) ------------
def _rope_head_tables(seq_len, head_dim, rotary_dim):
    rd = head_dim if rotary_dim is None else rotary_dim
    inv_freq = 1.0 / (10000.0 ** (np.arange(0, rd, 2, dtype=np.float32) / rd))
    sinusoid = np.arange(seq_len, dtype=np.float32)[:, None] * inv_freq[None, :]
    sin = np.repeat(np.sin(sinusoid), 2, axis=-1)                 # (T, rd)
    cos = np.repeat(np.cos(sinusoid), 2, axis=-1)                 # (T, rd)
    pad = head_dim - rd
    sin_full = np.pad(sin, ((0, 0), (0, pad)))                    # 0 past rotary
    cos_full = np.pad(cos, ((0, 0), (0, pad)), constant_values=1.0)
    return cos_full.astype(np.float32), sin_full.astype(np.float32)   # (T, hd)


def _rotation_matrix(head_dim, rotary_dim, num_heads):
    # x @ R == rotate_every_two(x) on the first rotary_dim lanes of each head.
    rd = head_dim if rotary_dim is None else rotary_dim
    rh = np.zeros((head_dim, head_dim), dtype=np.float32)
    for j in range(rd):
        if j % 2 == 0:
            rh[j + 1, j] = -1.0
        else:
            rh[j - 1, j] = 1.0
    return np.kron(np.eye(num_heads, dtype=np.float32), rh)       # (D, D)


def _arrange_qkv_weight(w_qkv, H, hd, mp_num, rotary_dim):
    """(3D, D) torch weight -> (D, 5D) fused [Q/s | V | K | rot(Q)/s | rot(K)]."""
    D = H * hd
    local = D // mp_num
    perm = []
    for part in range(3):              # torch split order inside mp group: q, v, k
        for m in range(mp_num):
            base = m * 3 * local + part * local
            perm.extend(range(base, base + local))
    w = jnp.asarray(w_qkv).T[:, jnp.asarray(perm)]                 # (D, 3D) head-major
    w_q, w_v, w_k = w[:, :D], w[:, D:2 * D], w[:, 2 * D:3 * D]
    rot = jnp.asarray(_rotation_matrix(hd, rotary_dim, H))         # (D, D)
    inv = jnp.float32(1.0 / math.sqrt(hd))                         # fold 1/sqrt(hd) into Q
    return jnp.concatenate(
        [w_q * inv, w_v, w_k, (w_q @ rot) * inv, w_k @ rot], axis=1)   # (D, 5D)


def _build_constants(R, T, H, hd, rotary_dim, masked_bias):
    """Stacked-head layout constants for R input rows per grid step (S = H*R rows)."""
    D = H * hd
    S = H * R
    cos_hd, sin_hd = _rope_head_tables(T, hd, rotary_dim)          # (T, hd)

    rows = np.arange(S)
    h_row = rows // R                  # head of a stacked row
    i_row = rows % R                   # input row within this step
    t_row = i_row % T                  # position within its sequence
    blk_row = i_row // T               # batch block within this step

    # --- head-select * cos/sin mask applied to the replicated projection ------
    cols = np.arange(5 * D)
    g_col = cols // D                  # 0:Q 1:V 2:K 3:rot(Q) 4:rot(K)
    d_col = (cols % D) % hd
    h_col = (cols % D) // hd
    head_match = (h_row[:, None] == h_col[None, :]).astype(np.float32)
    cos_rc = cos_hd[t_row][:, d_col]                               # (S, 5D)
    sin_rc = sin_hd[t_row][:, d_col]
    factor = np.where(np.isin(g_col, [0, 2])[None, :], cos_rc,
                      np.where(np.isin(g_col, [3, 4])[None, :], sin_rc, 1.0))
    mmask = (head_match * factor).astype(np.float32)               # (S, 5D)

    # --- routing matrix: sums Q+rot(Q) -> q_f, K+rot(K) -> k_f, V -> v --------
    dst = np.array([0, 2, 1, 0, 1])                                # group -> out slot
    route = np.zeros((5 * D, 3 * hd), dtype=np.float32)
    route[cols, dst[g_col] * hd + d_col] = 1.0

    # --- block-diagonal causal bias over the stacked (batch, head) blocks -----
    same = ((h_row[:, None] == h_row[None, :]) &
            (blk_row[:, None] == blk_row[None, :]) &
            (t_row[:, None] >= t_row[None, :]))
    bias = np.where(same, 0.0, masked_bias).astype(np.float32)     # (S, S)

    # --- un-stack constants ----------------------------------------------------
    lane_expand = np.tile(np.eye(hd, dtype=np.float32), (1, H))    # (hd, D)
    hsel = (h_row[:, None] == (np.arange(D) // hd)[None, :]).astype(np.float32)  # (S, D)
    collapse = np.tile(np.eye(R, dtype=np.float32), (1, H))        # (R, S)
    return mmask, route, bias, lane_expand, hsel, collapse


def _choose_num_grid_steps(batch):
    """v7x has 2 TensorCores -> keep a per-batch parallel grid; single-TC
    v5e/v6e -> collapse to one grid step (batch stacked into rows)."""
    try:
        kind = jax.devices()[0].device_kind.lower()
    except Exception:
        kind = ""
    if "v7" in kind or "7x" in kind:
        return batch
    return 1


# ---------------- wrapper ------------------------------------------------------
def progen_linear_block_forward(hidden, w_qkv):
    B, T, D = hidden.shape
    H, hd = NUM_HEADS, HEAD_DIM

    num_steps = _choose_num_grid_steps(B)
    R = (B * T) // num_steps           # input rows handled per grid step
    S = H * R                          # stacked (head-major) rows per step

    w5 = _arrange_qkv_weight(w_qkv, H, hd, MP_NUM, ROTARY_DIM)
    mmask, route, bias, lane_expand, hsel, collapse = map(
        jnp.asarray, _build_constants(R, T, H, hd, ROTARY_DIM, MASKED_BIAS))

    x2 = hidden.reshape(B * T, D)
    kernel = functools.partial(fused_block_kernel, num_heads=H, head_dim=hd)

    out2 = pl.pallas_call(
        kernel,
        grid=(num_steps,),
        in_specs=[
            pl.BlockSpec((R, D), lambda i: (i, 0)),            # x rows for this step
            pl.BlockSpec((D, 5 * D), lambda i: (0, 0)),        # fused qkv weight (resident)
            pl.BlockSpec((S, 5 * D), lambda i: (0, 0)),        # head-select * cos/sin mask
            pl.BlockSpec((5 * D, 3 * hd), lambda i: (0, 0)),   # column routing matrix
            pl.BlockSpec((S, S), lambda i: (0, 0)),            # block-diag causal bias
            pl.BlockSpec((hd, D), lambda i: (0, 0)),           # lane-expand (hd -> D)
            pl.BlockSpec((S, D), lambda i: (0, 0)),            # head mask on D lanes
            pl.BlockSpec((R, S), lambda i: (0, 0)),            # head-sum collapse
        ],
        out_specs=pl.BlockSpec((R, D), lambda i: (i, 0)),
        out_shape=jax.ShapeDtypeStruct((B * T, D), jnp.float32),
        compiler_params=pltpu.CompilerParams(
            dimension_semantics=("parallel",) if num_steps > 1 else ("arbitrary",)),
    )(x2, w5, mmask, route, bias, lane_expand, hsel, collapse)
    return out2.reshape(B, T, D)


# ---------------- pure-JAX reference (mirrors the torch code) -----------------
def reference_forward(hidden, w_qkv):
    B, T, D = hidden.shape
    H, hd = NUM_HEADS, HEAD_DIM
    qkv = hidden @ w_qkv.T
    local_dim = D // MP_NUM
    qkv_split = qkv.reshape(B, T, MP_NUM, 3 * local_dim)
    q = qkv_split[..., 0 * local_dim:1 * local_dim]
    v = qkv_split[..., 1 * local_dim:2 * local_dim]   # torch order: query, value, key
    k = qkv_split[..., 2 * local_dim:3 * local_dim]

    def split_heads(x):
        return x.reshape(B, T, MP_NUM, H // MP_NUM, hd).reshape(B, T, H, hd)

    q, k, v = split_heads(q), split_heads(k), split_heads(v)
    v = v.transpose(0, 2, 1, 3)

    rd = HEAD_DIM if ROTARY_DIM is None else ROTARY_DIM
    inv_freq = 1.0 / (10000.0 ** (jnp.arange(0, rd, 2, dtype=jnp.float32) / rd))
    sinusoid = jnp.arange(T, dtype=jnp.float32)[:, None] * inv_freq[None, :]
    sin_r = jnp.repeat(jnp.sin(sinusoid), 2, axis=-1)[None, :, None, :]
    cos_r = jnp.repeat(jnp.cos(sinusoid), 2, axis=-1)[None, :, None, :]

    def rotate_every_two(x):
        x1 = x[..., ::2]
        x2 = x[..., 1::2]
        return jnp.stack([-x2, x1], axis=-1).reshape(x.shape)

    def apply_rope(x):
        return x * cos_r + rotate_every_two(x) * sin_r

    if ROTARY_DIM is not None:
        k = jnp.concatenate([apply_rope(k[..., :rd]), k[..., rd:]], axis=-1)
        q = jnp.concatenate([apply_rope(q[..., :rd]), q[..., rd:]], axis=-1)
    else:
        k = apply_rope(k)
        q = apply_rope(q)

    k = k.transpose(0, 2, 1, 3)
    q = q.transpose(0, 2, 1, 3)

    scores = jnp.einsum("bhqd,bhkd->bhqk", q.astype(jnp.float32),
                        k.astype(jnp.float32)) / jnp.float32(math.sqrt(hd))
    mask = jnp.tril(jnp.ones((T, T), dtype=bool))
    scores = jnp.where(mask, scores, jnp.float32(MASKED_BIAS))
    p = jax.nn.softmax(scores, axis=-1)
    attn = jnp.einsum("bhqk,bhkd->bhqd", p, v)
    attn = attn.transpose(0, 2, 1, 3).reshape(B, T, D)
    return attn + 2.0 * hidden


# ---------------- main ---------------------------------------------------------
if __name__ == "__main__":
    key = jax.random.PRNGKey(0)
    k_x, k_w = jax.random.split(key)
    hidden_states = jax.random.normal(k_x, (BATCH, SEQ, HIDDEN), dtype=jnp.float32)
    # qkv_proj: nn.Linear(embed_dim, 3*embed_dim, bias=False) -> weight (3D, D).
    # (Original module zero-inits this weight; we use deterministic randoms.)
    w_qkv = 0.02 * jax.random.normal(k_w, (3 * HIDDEN, HIDDEN), dtype=jnp.float32)

    out = jax.block_until_ready(progen_linear_block_forward(hidden_states, w_qkv))
    ref = jax.block_until_ready(reference_forward(hidden_states, w_qkv))

    if not jnp.allclose(out, ref, atol=2e-3, rtol=2e-3):
        max_err = float(jnp.max(jnp.abs(out - ref)))
        raise AssertionError(f"Pallas output mismatch, max abs err = {max_err}")

    print("KERNEL_OK")
</pallas_src>

<mosaic_0001>
module attributes {stable_mosaic.version = 11 : i64} {
  func.func @fused_block_kernel(%arg0: i32, %arg1: memref<16x64xf32, #tpu.memory_space<vmem>>, %arg2: memref<64x320xf32, #tpu.memory_space<vmem>>, %arg3: memref<128x320xf32, #tpu.memory_space<vmem>>, %arg4: memref<320x24xf32, #tpu.memory_space<vmem>>, %arg5: memref<128x128xf32, #tpu.memory_space<vmem>>, %arg6: memref<8x64xf32, #tpu.memory_space<vmem>>, %arg7: memref<128x64xf32, #tpu.memory_space<vmem>>, %arg8: memref<16x128xf32, #tpu.memory_space<vmem>>, %arg9: memref<16x64xf32, #tpu.memory_space<vmem>>) attributes {dimension_semantics = [#tpu.dimension_semantics<arbitrary>], iteration_bounds = array<i64: 1>, scalar_prefetch = 0 : i64, scratch_operands = 0 : i64, tpu.core_type = #tpu.core_type<tc>, window_params = [{transform_indices = @transform_0, window_bounds = array<i64: 16, 64>}, {pipeline_mode = #tpu.pipeline_mode<synchronous>, transform_indices = @transform_1, window_bounds = array<i64: 64, 320>}, {pipeline_mode = #tpu.pipeline_mode<synchronous>, transform_indices = @transform_2, window_bounds = array<i64: 128, 320>}, {pipeline_mode = #tpu.pipeline_mode<synchronous>, transform_indices = @transform_3, window_bounds = array<i64: 320, 24>}, {pipeline_mode = #tpu.pipeline_mode<synchronous>, transform_indices = @transform_4, window_bounds = array<i64: 128, 128>}, {pipeline_mode = #tpu.pipeline_mode<synchronous>, transform_indices = @transform_5, window_bounds = array<i64: 8, 64>}, {pipeline_mode = #tpu.pipeline_mode<synchronous>, transform_indices = @transform_6, window_bounds = array<i64: 128, 64>}, {pipeline_mode = #tpu.pipeline_mode<synchronous>, transform_indices = @transform_7, window_bounds = array<i64: 16, 128>}, {transform_indices = @transform_8, window_bounds = array<i64: 16, 64>}]} {
    %c0 = arith.constant 0 : index
    %c0_0 = arith.constant 0 : index
    %0 = vector.load %arg1[%c0, %c0_0] : memref<16x64xf32, #tpu.memory_space<vmem>>, vector<16x64xf32>
    %c0_1 = arith.constant 0 : index
    %c0_2 = arith.constant 0 : index
    %1 = vector.load %arg2[%c0_1, %c0_2] : memref<64x320xf32, #tpu.memory_space<vmem>>, vector<64x320xf32>
    %cst = arith.constant dense<0.000000e+00> : vector<16x320xf32>
    %2 = tpu.matmul %0, %1, %cst {dimension_numbers = #tpu.dot_dimension_numbers<[1], [0], [0], [1], [0, 0, 1, 1], [], []>} : vector<16x64xf32>, vector<64x320xf32>, vector<16x320xf32> -> vector<16x320xf32>
    %3 = tpu.concatenate %2, %2, %2, %2, %2, %2, %2, %2 in 0 : vector<16x320xf32>, vector<16x320xf32>, vector<16x320xf32>, vector<16x320xf32>, vector<16x320xf32>, vector<16x320xf32>, vector<16x320xf32>, vector<16x320xf32> -> vector<128x320xf32>
    %c0_3 = arith.constant 0 : index
    %c0_4 = arith.constant 0 : index
    %4 = vector.load %arg3[%c0_3, %c0_4] : memref<128x320xf32, #tpu.memory_space<vmem>>, vector<128x320xf32>
    %5 = arith.mulf %3, %4 : vector<128x320xf32>
    %c0_5 = arith.constant 0 : index
    %c0_6 = arith.constant 0 : index
    %6 = vector.load %arg4[%c0_5, %c0_6] : memref<320x24xf32, #tpu.memory_space<vmem>>, vector<320x24xf32>
    %cst_7 = arith.constant dense<0.000000e+00> : vector<128x24xf32>
    %7 = tpu.matmul %5, %6, %cst_7 {dimension_numbers = #tpu.dot_dimension_numbers<[1], [0], [0], [1], [0, 0, 1, 1], [], []>} : vector<128x320xf32>, vector<320x24xf32>, vector<128x24xf32> -> vector<128x24xf32>
    %8 = vector.extract_strided_slice %7 {offsets = [0, 0], sizes = [128, 8], strides = [1, 1]} : vector<128x24xf32> to vector<128x8xf32>
    %9 = vector.extract_strided_slice %7 {offsets = [0, 8], sizes = [128, 8], strides = [1, 1]} : vector<128x24xf32> to vector<128x8xf32>
    %10 = vector.extract_strided_slice %7 {offsets = [0, 16], sizes = [128, 8], strides = [1, 1]} : vector<128x24xf32> to vector<128x8xf32>
    %cst_8 = arith.constant dense<0.000000e+00> : vector<128x128xf32>
    %11 = tpu.matmul %8, %9, %cst_8 {dimension_numbers = #tpu.dot_dimension_numbers<[1], [1], [0], [0], [0, 0, 1, 0], [], []>} : vector<128x8xf32>, vector<128x8xf32>, vector<128x128xf32> -> vector<128x128xf32>
    %c0_9 = arith.constant 0 : index
    %c0_10 = arith.constant 0 : index
    %12 = vector.load %arg5[%c0_9, %c0_10] : memref<128x128xf32, #tpu.memory_space<vmem>>, vector<128x128xf32>
    %13 = arith.addf %11, %12 : vector<128x128xf32>
    %cst_11 = arith.constant dense<0xFF800000> : vector<128xf32>
    %14 = vector.multi_reduction <maximumf>, %13, %cst_11 [1] : vector<128x128xf32> to vector<128xf32>
    %15 = vector.shape_cast %14 : vector<128xf32> to vector<128x1xf32>
    %16 = vector.broadcast %15 : vector<128x1xf32> to vector<128x128xf32>
    %17 = arith.subf %13, %16 : vector<128x128xf32>
    %18 = math.exp %17 : vector<128x128xf32>
    %cst_12 = arith.constant dense<0.000000e+00> : vector<128xf32>
    %19 = vector.multi_reduction <add>, %18, %cst_12 [1] : vector<128x128xf32> to vector<128xf32>
    %20 = vector.shape_cast %19 : vector<128xf32> to vector<128x1xf32>
    %21 = vector.broadcast %20 : vector<128x1xf32> to vector<128x128xf32>
    %22 = arith.divf %18, %21 : vector<128x128xf32>
    %cst_13 = arith.constant dense<0.000000e+00> : vector<128x8xf32>
    %23 = tpu.matmul %22, %10, %cst_13 {dimension_numbers = #tpu.dot_dimension_numbers<[1], [0], [0], [1], [0, 0, 1, 1], [], []>} : vector<128x128xf32>, vector<128x8xf32>, vector<128x8xf32> -> vector<128x8xf32>
    %c0_14 = arith.constant 0 : index
    %c0_15 = arith.constant 0 : index
    %24 = vector.load %arg6[%c0_14, %c0_15] : memref<8x64xf32, #tpu.memory_space<vmem>>, vector<8x64xf32>
    %cst_16 = arith.constant dense<0.000000e+00> : vector<128x64xf32>
    %25 = tpu.matmul %23, %24, %cst_16 {dimension_numbers = #tpu.dot_dimension_numbers<[1], [0], [0], [1], [0, 0, 1, 1], [], []>} : vector<128x8xf32>, vector<8x64xf32>, vector<128x64xf32> -> vector<128x64xf32>
    %c0_17 = arith.constant 0 : index
    %c0_18 = arith.constant 0 : index
    %26 = vector.load %arg7[%c0_17, %c0_18] : memref<128x64xf32, #tpu.memory_space<vmem>>, vector<128x64xf32>
    %27 = arith.mulf %25, %26 : vector<128x64xf32>
    %c0_19 = arith.constant 0 : index
    %c0_20 = arith.constant 0 : index
    %28 = vector.load %arg8[%c0_19, %c0_20] : memref<16x128xf32, #tpu.memory_space<vmem>>, vector<16x128xf32>
    %cst_21 = arith.constant dense<0.000000e+00> : vector<16x64xf32>
    %29 = tpu.matmul %28, %27, %cst_21 {dimension_numbers = #tpu.dot_dimension_numbers<[1], [0], [0], [1], [0, 0, 1, 1], [], []>} : vector<16x128xf32>, vector<128x64xf32>, vector<16x64xf32> -> vector<16x64xf32>
    %cst_22 = arith.constant 2.000000e+00 : f32
    %30 = vector.broadcast %cst_22 : f32 to vector<16x64xf32>
    %31 = arith.mulf %30, %0 : vector<16x64xf32>
    %32 = arith.addf %29, %31 : vector<16x64xf32>
    %c0_23 = arith.constant 0 : index
    %c0_24 = arith.constant 0 : index
    %33 = vector.load %arg9[%c0_23, %c0_24] : memref<16x64xf32, #tpu.memory_space<vmem>>, vector<16x64xf32>
    tpu.vector_store %arg9[%c0_23, %c0_24], %32 {strides = array<i32>} : memref<16x64xf32, #tpu.memory_space<vmem>>, vector<16x64xf32>,
    return
  }
  func.func @transform_0(%arg0: i32) -> (i32, i32) {
    %c0_i32 = arith.constant 0 : i32
    %c0_i32_0 = arith.constant 0 : i32
    return %arg0, %c0_i32 : i32, i32
  }
  func.func @transform_1(%arg0: i32) -> (i32, i32) {
    %c0_i32 = arith.constant 0 : i32
    %c0_i32_0 = arith.constant 0 : i32
    %c0_i32_1 = arith.constant 0 : i32
    return %c0_i32, %c0_i32_0 : i32, i32
  }
  func.func @transform_2(%arg0: i32) -> (i32, i32) {
    %c0_i32 = arith.constant 0 : i32
    %c0_i32_0 = arith.constant 0 : i32
    %c0_i32_1 = arith.constant 0 : i32
    return %c0_i32, %c0_i32_0 : i32, i32
  }
  func.func @transform_3(%arg0: i32) -> (i32, i32) {
    %c0_i32 = arith.constant 0 : i32
    %c0_i32_0 = arith.constant 0 : i32
    %c0_i32_1 = arith.constant 0 : i32
    return %c0_i32, %c0_i32_0 : i32, i32
  }
  func.func @transform_4(%arg0: i32) -> (i32, i32) {
    %c0_i32 = arith.constant 0 : i32
    %c0_i32_0 = arith.constant 0 : i32
    %c0_i32_1 = arith.constant 0 : i32
    return %c0_i32, %c0_i32_0 : i32, i32
  }
  func.func @transform_5(%arg0: i32) -> (i32, i32) {
    %c0_i32 = arith.constant 0 : i32
    %c0_i32_0 = arith.constant 0 : i32
    %c0_i32_1 = arith.constant 0 : i32
    return %c0_i32, %c0_i32_0 : i32, i32
  }
  func.func @transform_6(%arg0: i32) -> (i32, i32) {
    %c0_i32 = arith.constant 0 : i32
    %c0_i32_0 = arith.constant 0 : i32
    %c0_i32_1 = arith.constant 0 : i32
    return %c0_i32, %c0_i32_0 : i32, i32
  }
  func.func @transform_7(%arg0: i32) -> (i32, i32) {
    %c0_i32 = arith.constant 0 : i32
    %c0_i32_0 = arith.constant 0 : i32
    %c0_i32_1 = arith.constant 0 : i32
    return %c0_i32, %c0_i32_0 : i32, i32
  }
  func.func @transform_8(%arg0: i32) -> (i32, i32) {
    %c0_i32 = arith.constant 0 : i32
    %c0_i32_0 = arith.constant 0 : i32
    return %arg0, %c0_i32 : i32, i32
  }
}

</mosaic_0001>

<bundles_post_ra>
// kernel: tpu_custom_call.1
= control target key start
LH: loop header
LB: loop body
LE: loop exit
PB: predicated region body
PF: predicated region fallthrough
CT: control target
= control target key end

     0   :  { %vm56_vm0 = vcmask 523264   ;;  %s2503_s0 = inlined_call_operand.vmem [shape: f32[16,64], index: 0, kind: input, shape index: {}]   ;;  %s2504_s1 = inlined_call_operand.vmem [shape: f32[64,320], index: 1, kind: input, shape index: {}]   ;;  %s2505_s2 = inlined_call_operand.vmem [shape: f32[128,320], index: 2, kind: input, shape index: {}]   ;;  %s2506_s3 = inlined_call_operand.vmem [shape: f32[320,24], index: 3, kind: input, shape index: {}]   ;;  %s2507_s4 = inlined_call_operand.vmem [shape: f32[128,128], index: 4, kind: input, shape index: {}]   ;;  %s2508_s5 = inlined_call_operand.vmem [shape: f32[8,64], index: 5, kind: input, shape index: {}]   ;;  %s2509_s6 = inlined_call_operand.vmem [shape: f32[128,64], index: 6, kind: input, shape index: {}]   ;;  %s2510_s7 = inlined_call_operand.vmem [shape: f32[16,128], index: 7, kind: input, shape index: {}]   ;;  %s2511_s8 = inlined_call_operand.hbm [shape: f32[16,64], index: 8, kind: output, shape index: {}]  }
   0x1   :  { %v53_v0 = vld [vmem:[%s2504_s1 + $0xa8] sm:$0xff]  ;;  %v54_v1 = vld [vmem:[%s2504_s1 + $0xb0] sm:$0xff]  ;;  %v55_v2 = vld [vmem:[%s2504_s1 + $0xb8] sm:$0xff] }
   0x2   :  { %71 = vmatpush.msra.mxu0 %v53_v0  ;;  %94 = vmatpush.msra.mxu1 %v54_v1  ;;  %v50_v3 = vld [vmem:[%s2504_s1 + $0x90] sm:$0xff]  ;;  %v51_v4 = vld [vmem:[%s2504_s1 + $0x98] sm:$0xff]  ;;  %v52_v5 = vld [vmem:[%s2504_s1 + $0xa0] sm:$0xff] }
   0x3   :  { %117 = vmatpush.msra.mxu2 %v55_v2  ;;  %v47_v6 = vld [vmem:[%s2504_s1 + $0x78] sm:$0xff]  ;;  %v48_v7 = vld [vmem:[%s2504_s1 + $0x80] sm:$0xff]  ;;  %v49_v8 = vld [vmem:[%s2504_s1 + $0x88] sm:$0xff] }
   0x4   :  { %72 = vmatpush.msra.mxu0 %v50_v3  ;;  %95 = vmatpush.msra.mxu1 %v51_v4  ;;  %v44_v9 = vld [vmem:[%s2504_s1 + $0x60] sm:$0xff]  ;;  %v45_v10 = vld [vmem:[%s2504_s1 + $0x68] sm:$0xff]  ;;  %v46_v11 = vld [vmem:[%s2504_s1 + $0x70] sm:$0xff] }
   0x5   :  { %118 = vmatpush.msra.mxu2 %v52_v5  ;;  %v41_v12 = vld [vmem:[%s2504_s1 + $0x48] sm:$0xff]  ;;  %v42_v13 = vld [vmem:[%s2504_s1 + $0x50] sm:$0xff]  ;;  %v43_v14 = vld [vmem:[%s2504_s1 + $0x58] sm:$0xff] }
   0x6   :  { %73 = vmatpush.msra.mxu0 %v47_v6  ;;  %96 = vmatpush.msra.mxu1 %v48_v7  ;;  %v38_v15 = vld [vmem:[%s2504_s1 + $0x30] sm:$0xff]  ;;  %v39_v16 = vld [vmem:[%s2504_s1 + $0x38] sm:$0xff]  ;;  %v40_v18 = vld [vmem:[%s2504_s1 + $0x40] sm:$0xff] }
   0x7   :  { %119 = vmatpush.msra.mxu2 %v49_v8  ;;  %v243_v17 = vld [vmem:[%s2506_s3 + $0x78] sm:$0xff]  ;;  %v242_v19 = vld [vmem:[%s2506_s3 + $0x70] sm:$0xff]  ;;  %v36_v21 = vld [vmem:[%s2504_s1 + $0x20] sm:$0xff] }
   0x8   :  { %74 = vmatpush.msra.mxu0 %v44_v9  ;;  %97 = vmatpush.msra.mxu1 %v45_v10  ;;  %v35_v20 = vld [vmem:[%s2504_s1 + $0x18] sm:$0xff]  ;;  %v37_v22 = vld [vmem:[%s2504_s1 + $0x28] sm:$0xff]  ;;  %v32_v24 = vld [vmem:[%s2504_s1] sm:$0xff] }
   0x9   :  { %120 = vmatpush.msra.mxu2 %v46_v11  ;;  %316 = vmatpush.msra.mxu3 %v243_v17  ;;  %v241_v23 = vld [vmem:[%s2506_s3 + $0x68] sm:$0xff]  ;;  %v34_v26 = vld [vmem:[%s2504_s1 + $0x10] sm:$0xff]  ;;  %v30_v27 = vld [vmem:[%s2503_s0] sm:$0xff] }
   0xa   :  { %75 = vmatpush.msra.mxu0 %v41_v12  ;;  %98 = vmatpush.msra.mxu1 %v42_v13  ;;  %v33_v25 = vld [vmem:[%s2504_s1 + $0x8] sm:$0xff]  ;;  %v259_v28 = vld [vmem:[%s2506_s3 + $0xf8] sm:$0xff]  ;;  %v240_v29 = vld [vmem:[%s2506_s3 + $0x60] sm:$0xff] }
   0xb   :  { %121 = vmatpush.msra.mxu2 %v43_v14  ;;  %317 = vmatpush.msra.mxu3 %v242_v19  ;;  %v258_v30 = vld [vmem:[%s2506_s3 + $0xf0] sm:$0xff]  ;;  %v239_v31 = vld [vmem:[%s2506_s3 + $0x58] sm:$0xff] }
   0xc   :  { %76 = vmatpush.msra.mxu0 %v38_v15  ;;  %99 = vmatpush.msra.mxu1 %v39_v16 }
   0xd   :  { %122 = vmatpush.msra.mxu2 %v40_v18  ;;  %318 = vmatpush.msra.mxu3 %v241_v23 }
   0xe   :  { %77 = vmatpush.msra.mxu0 %v35_v20  ;;  %100 = vmatpush.msra.mxu1 %v36_v21 }
   0xf   :  { %123 = vmatpush.msra.mxu2 %v37_v22  ;;  %319 = vmatpush.msra.mxu3 %v240_v29 }
  0x10   :  { %78 = vmatpush.msra.mxu0 %v32_v24  ;;  %101 = vmatpush.msra.mxu1 %v33_v25 }
  0x11   :  { %124 = vmatpush.msra.mxu2 %v34_v26  ;;  %1363 = vmatmul.msk.f32.vlgmr.msra.gmra.mxu0 %vm56_vm0, %v30_v27 }
  0x12   :  { %1365 = vmatmul.msk.f32.vlgmr.msra.gmra.mxu1 %vm56_vm0, %v30_v27  ;;  %1367 = vmatmul.msk.f32.vlgmr.msra.gmra.mxu2 %vm56_vm0, %v30_v27 }
  0x13   :  { %381 = vmatpush.msrb.mxu0 %v259_v28 }
  0x14   :  { %13 = vsyncpa [#allocation3], 0  ;;  %v257_v32 = vld [vmem:[%s2506_s3 + $0xe8] sm:$0xff]  ;;  %v238_v33 = vld [vmem:[%s2506_s3 + $0x50] sm:$0xff]  ;;  %320 = vmatpush.msra.mxu3 %v239_v31  ;;  %s1580_s23 = smov 112   ;;  %vm575_vm1 = vcmask 64512  }
  0x15   :  { %382 = vmatpush.msrb.mxu0 %v258_v30  ;;  %v31_v34 = vld [vmem:[%s2503_s0 + $0x8] sm:$0xff]  ;;  %v256_v36 = vld [vmem:[%s2506_s3 + $0xe0] sm:$0xff]  ;;  %v255_v38 = vld [vmem:[%s2506_s3 + $0xd8] sm:$0xff]  ;;  %s1581_s20 = smov [#allocation2]  }
  0x16   :  { %v237_v35 = vld [vmem:[%s2506_s3 + $0x48] sm:$0xff]  ;;  %321 = vmatpush.msra.mxu3 %v238_v33  ;;  %v236_v37 = vld [vmem:[%s2506_s3 + $0x40] sm:$0xff]  ;;  %v235_v39 = vld [vmem:[%s2506_s3 + $0x38] sm:$0xff]  ;;  %s1349_s1 = sshll.u32 %s1581_s20, 4  ;;  %s1350_s1 = int_to_ptr.vmem [resolvable:$true] %s1349_s1 }
  0x17   :  { %383 = vmatpush.msrb.mxu0 %v257_v32  ;;  %v254_v40 = vld [vmem:[%s2506_s3 + $0xd0] sm:$0xff]  ;;  %v253_v42 = vld [vmem:[%s2506_s3 + $0xc8] sm:$0xff]  ;;  %v252_v44 = vld [vmem:[%s2506_s3 + $0xc0] sm:$0xff] }
  0x18   :  { %322 = vmatpush.msra.mxu3 %v237_v35  ;;  %v234_v41 = vld [vmem:[%s2506_s3 + $0x30] sm:$0xff]  ;;  %v233_v43 = vld [vmem:[%s2506_s3 + $0x28] sm:$0xff]  ;;  %v232_v45 = vld [vmem:[%s2506_s3 + $0x20] sm:$0xff] }
  0x19   :  { %1364 = vmatmul.msk.f32.gmra.mxu0 %vm56_vm0, %v31_v34  ;;  %v251_v46 = vld [vmem:[%s2506_s3 + $0xb8] sm:$0xff]  ;;  %v250_v48 = vld [vmem:[%s2506_s3 + $0xb0] sm:$0xff]  ;;  %v249_v50 = vld [vmem:[%s2506_s3 + $0xa8] sm:$0xff] }
  0x1a   :  { %1366 = vmatmul.msk.f32.gmra.mxu1 %vm56_vm0, %v31_v34  ;;  %1368 = vmatmul.msk.f32.gmra.mxu2 %vm56_vm0, %v31_v34  ;;  %v231_v47 = vld [vmem:[%s2506_s3 + $0x18] sm:$0xff]  ;;  %v230_v49 = vld [vmem:[%s2506_s3 + $0x10] sm:$0xff]  ;;  %v248_v51 = vld [vmem:[%s2506_s3 + $0xa0] sm:$0xff] }
  0x1b   :  { %384 = vmatpush.msrb.mxu0 %v256_v36  ;;  %323 = vmatpush.msra.mxu3 %v236_v37  ;;  %v247_v52 = vld [vmem:[%s2506_s3 + $0x98] sm:$0xff]  ;;  %v246_v53 = vld [vmem:[%s2506_s3 + $0x90] sm:$0xff]  ;;  %v229_v54 = vld [vmem:[%s2506_s3 + $0x8] sm:$0xff] }
  0x1c   :  { %v245_v55 = vld [vmem:[%s2506_s3 + $0x88] sm:$0xff]  ;;  %v228_v56 = vld [vmem:[%s2506_s3] sm:$0xff]  ;;  %v267_v58 = vld [vmem:[%s2506_s3 + $0x138] sm:$0xff] }
  0x1d   :  { %385 = vmatpush.msrb.mxu0 %v255_v38  ;;  %324 = vmatpush.msra.mxu3 %v235_v39  ;;  %v244_v57 = vld [vmem:[%s2506_s3 + $0x80] sm:$0xff]  ;;  %v266_v59 = vld [vmem:[%s2506_s3 + $0x130] sm:$0xff]  ;;  %v265_v60 = vld [vmem:[%s2506_s3 + $0x128] sm:$0xff] }
  0x1e   :  { %1433 = vmatpush.msrb.mxu1 %v267_v58  ;;  %v264_v61 = vld [vmem:[%s2506_s3 + $0x120] sm:$0xff]  ;;  %v263_v62 = vld [vmem:[%s2506_s3 + $0x118] sm:$0xff]  ;;  %v262_v63 = vld [vmem:[%s2506_s3 + $0x110] sm:$0xff] }
  0x1f   :  { %386 = vmatpush.msrb.mxu0 %v254_v40  ;;  %325 = vmatpush.msra.mxu3 %v234_v41  ;;  %v261_v0 = vld [vmem:[%s2506_s3 + $0x108] sm:$0xff]  ;;  %v260_v1 = vld [vmem:[%s2506_s3 + $0x100] sm:$0xff]  ;;  %v135_v8 = vld [vmem:[%s2505_s2 + $0x18] sm:$0xff] }
  0x20   :  { %1434 = vmatpush.msrb.mxu1 %v266_v59  ;;  %v132_v2 = vld [vmem:[%s2505_s2] sm:$0xff]  ;;  %v133_v3 = vld [vmem:[%s2505_s2 + $0x8] sm:$0xff]  ;;  %v138_v16 = vld [vmem:[%s2505_s2 + $0x30] sm:$0xff] }
  0x21   :  { %387 = vmatpush.msrb.mxu0 %v253_v42  ;;  %326 = vmatpush.msra.mxu3 %v233_v43  ;;  %v136_v10 = vld [vmem:[%s2505_s2 + $0x20] sm:$0xff]  ;;  %v149_v15 = vld [vmem:[%s2505_s2 + $0x88] sm:$0xff]  ;;  %v139_v18 = vld [vmem:[%s2505_s2 + $0x38] sm:$0xff] }
  0x22   :  { %1435 = vmatpush.msrb.mxu1 %v265_v60  ;;  %v152_v22 = vld [vmem:[%s2505_s2 + $0xa0] sm:$0xff]  ;;  %v141_v24 = vld [vmem:[%s2505_s2 + $0x48] sm:$0xff]  ;;  %v142_v25 = vld [vmem:[%s2505_s2 + $0x50] sm:$0xff] }
  0x23   :  { %388 = vmatpush.msrb.mxu0 %v252_v44  ;;  %327 = vmatpush.msra.mxu3 %v232_v45  ;;  %v155_v28 = vld [vmem:[%s2505_s2 + $0xb8] sm:$0xff]  ;;  %v144_v30 = vld [vmem:[%s2505_s2 + $0x60] sm:$0xff]  ;;  %v145_v31 = vld [vmem:[%s2505_s2 + $0x68] sm:$0xff] }
  0x24   :  { %1436 = vmatpush.msrb.mxu1 %v264_v61  ;;  %v158_v34 = vld [vmem:[%s2505_s2 + $0xd0] sm:$0xff]  ;;  %v147_v36 = vld [vmem:[%s2505_s2 + $0x78] sm:$0xff]  ;;  %v148_v37 = vld [vmem:[%s2505_s2 + $0x80] sm:$0xff] }
  0x25   :  { %389 = vmatpush.msrb.mxu0 %v251_v46  ;;  %328 = vmatpush.msra.mxu3 %v231_v47  ;;  %v161_v40 = vld [vmem:[%s2505_s2 + $0xe8] sm:$0xff]  ;;  %v150_v42 = vld [vmem:[%s2505_s2 + $0x90] sm:$0xff]  ;;  %v151_v43 = vld [vmem:[%s2505_s2 + $0x98] sm:$0xff] }
  0x26   :  { %1437 = vmatpush.msrb.mxu1 %v263_v62  ;;  %v164_v46 = vld [vmem:[%s2505_s2 + $0x100] sm:$0xff]  ;;  %v153_v47 = vld [vmem:[%s2505_s2 + $0xa8] sm:$0xff] }
  0x27   :  { %390 = vmatpush.msrb.mxu0 %v250_v48  ;;  %329 = vmatpush.msra.mxu3 %v230_v49  ;;  %v154_v48 = vld [vmem:[%s2505_s2 + $0xb0] sm:$0xff] }
  0x28   :  { %1438 = vmatpush.msrb.mxu1 %v262_v63 }
  0x29   :  { %391 = vmatpush.msrb.mxu0 %v249_v50  ;;  %330 = vmatpush.msra.mxu3 %v229_v54  ;;  %v157_v54 = vld [vmem:[%s2505_s2 + $0xc8] sm:$0xff] }
  0x2a   :  { %1439 = vmatpush.msrb.mxu1 %v261_v0 }
  0x2b   :  { %392 = vmatpush.msrb.mxu0 %v248_v51  ;;  %331 = vmatpush.msra.mxu3 %v228_v56 }
  0x2c   :  { %1440 = vmatpush.msrb.mxu1 %v260_v1 }
  0x2d   :  { %393 = vmatpush.msrb.mxu0 %v247_v52  ;;  %v167_v52 = vld [vmem:[%s2505_s2 + $0x118] sm:$0xff] }
  0x2f   :  { %394 = vmatpush.msrb.mxu0 %v246_v53  ;;  %v156_v53 = vld [vmem:[%s2505_s2 + $0xc0] sm:$0xff] }
  0x31   :  { %395 = vmatpush.msrb.mxu0 %v245_v55 }
  0x33   :  { %396 = vmatpush.msrb.mxu0 %v244_v57 }
  0x35   :  { %454 = vmatpush.msra.mxu0 %v267_v58  ;;  %v170_v58 = vld [vmem:[%s2505_s2 + $0x130] sm:$0xff] }
  0x37   :  { %455 = vmatpush.msra.mxu0 %v266_v59  ;;  %v159_v59 = vld [vmem:[%s2505_s2 + $0xd8] sm:$0xff] }
  0x39   :  { %456 = vmatpush.msra.mxu0 %v265_v60  ;;  %v160_v60 = vld [vmem:[%s2505_s2 + $0xe0] sm:$0xff] }
  0x3b   :  { %457 = vmatpush.msra.mxu0 %v264_v61 }
  0x3d   :  { %458 = vmatpush.msra.mxu0 %v263_v62 }
  0x3f   :  { %459 = vmatpush.msra.mxu0 %v262_v63 }
  0x41   :  { %460 = vmatpush.msra.mxu0 %v261_v0  ;;  %v173_v0 = vld [vmem:[%s2505_s2 + $0x148] sm:$0xff] }
  0x43   :  { %461 = vmatpush.msra.mxu0 %v260_v1  ;;  %v162_v1 = vld [vmem:[%s2505_s2 + $0xf0] sm:$0xff] }
  0x8e   :  { %v1839_v4 = vpop.f32.mrf.mxu0 }
  0x8f   :  { %v1841_v5 = vpop.f32.mrf.mxu1  ;;  %v180_v6 = vmul.f32 %v132_v2, %v1839_v4  ;;  %v186_v20 = vmul.f32 %v138_v16, %v1839_v4  ;;  %v192_v32 = vmul.f32 %v144_v30, %v1839_v4  ;;  %v198_v44 = vmul.f32 %v150_v42, %v1839_v4  ;;  %v163_v2 = vld [vmem:[%s2505_s2 + $0xf8] sm:$0xff] }
  0x90   :  { %v181_v7 = vmul.f32 %v133_v3, %v1841_v5  ;;  %v187_v21 = vmul.f32 %v139_v18, %v1841_v5  ;;  %v193_v33 = vmul.f32 %v145_v31, %v1841_v5  ;;  %v199_v45 = vmul.f32 %v151_v43, %v1841_v5  ;;  %v179_v18 = vld [vmem:[%s2505_s2 + $0x178] sm:$0xff] }
  0x91   :  { %332 = vmatmul.f32.vlgmr.msra.gmra.mxu3 %v180_v6  ;;  %v204_v56 = vmul.f32 %v156_v53, %v1839_v4  ;;  %v205_v57 = vmul.f32 %v157_v54, %v1841_v5  ;;  %v210_v6 = vmul.f32 %v162_v1, %v1839_v4 }
  0x92   :  { %397 = vmatmul.f32.vlgmr.msrb.gmra.mxu0 %v181_v7  ;;  %v211_v7 = vmul.f32 %v163_v2, %v1841_v5 }
  0x95   :  { %v1848_v9 = vpop.f32.mrf.mxu2 }
  0x96   :  { %v1853_v11 = vpop.f32.mrf.mxu0  ;;  %v200_v23 = vmul.f32 %v152_v22, %v1848_v9  ;;  %v206_v35 = vmul.f32 %v158_v34, %v1848_v9  ;;  %v212_v49 = vmul.f32 %v164_v46, %v1848_v9  ;;  %v218_v61 = vmul.f32 %v170_v58, %v1848_v9 }
  0x97   :  { %v1855_v12 = vpop.f32.mrf.mxu1  ;;  %v183_v13 = vmul.f32 %v135_v8, %v1853_v11  ;;  %v189_v26 = vmul.f32 %v141_v24, %v1853_v11  ;;  %v195_v38 = vmul.f32 %v147_v36, %v1853_v11  ;;  %v201_v50 = vmul.f32 %v153_v47, %v1853_v11  ;;  %v176_v8 = vld [vmem:[%s2505_s2 + $0x160] sm:$0xff]  ;;  %v171_v24 = vld [vmem:[%s2505_s2 + $0x138] sm:$0xff] }
  0x98   :  { %v184_v14 = vmul.f32 %v136_v10, %v1855_v12  ;;  %v190_v27 = vmul.f32 %v142_v25, %v1855_v12  ;;  %v196_v39 = vmul.f32 %v148_v37, %v1855_v12  ;;  %v202_v51 = vmul.f32 %v154_v48, %v1855_v12  ;;  %v165_v10 = vld [vmem:[%s2505_s2 + $0x108] sm:$0xff]  ;;  %v172_v25 = vld [vmem:[%s2505_s2 + $0x140] sm:$0xff] }
  0x99   :  { %335 = vmatmul.f32.gmra.mxu3 %v183_v13  ;;  %v207_v62 = vmul.f32 %v159_v59, %v1853_v11  ;;  %v208_v63 = vmul.f32 %v160_v60, %v1855_v12  ;;  %v166_v13 = vld [vmem:[%s2505_s2 + $0x110] sm:$0xff] }
  0x9a   :  { %400 = vmatmul.f32.gmra.mxu0 %v184_v14  ;;  %v224_v14 = vmul.f32 %v176_v8, %v1848_v9  ;;  %v214_v16 = vmul.f32 %v166_v13, %v1855_v12 }
  0x9d   :  { %v1865_v17 = vpop.f32.mrf.mxu2 }
  0x9e   :  { %v197_v19 = vmul.f32 %v149_v15, %v1865_v17  ;;  %v203_v29 = vmul.f32 %v155_v28, %v1865_v17  ;;  %v209_v41 = vmul.f32 %v161_v40, %v1865_v17  ;;  %v215_v55 = vmul.f32 %v167_v52, %v1865_v17  ;;  %v174_v28 = vld [vmem:[%s2505_s2 + $0x150] sm:$0xff]  ;;  %v140_v40 = vld [vmem:[%s2505_s2 + $0x40] sm:$0xff] }
  0x9f   :  { %v221_v3 = vmul.f32 %v173_v0, %v1865_v17  ;;  %v213_v15 = vmul.f32 %v165_v10, %v1853_v11  ;;  %v222_v30 = vmul.f32 %v174_v28, %v1839_v4  ;;  %v188_v42 = vmul.f32 %v140_v40, %v1848_v9 }
  0xa0   :  { %1374 = vmatmul.msk.f32.vlgmr.msrb.gmra.mxu1 %vm56_vm0, %v197_v19  ;;  %v168_v19 = vld [vmem:[%s2505_s2 + $0x120] sm:$0xff] }
  0xa1   :  { %338 = vmatmul.f32.gmra.mxu3 %v186_v20  ;;  %v169_v20 = vld [vmem:[%s2505_s2 + $0x128] sm:$0xff]  ;;  %v216_v22 = vmul.f32 %v168_v19, %v1839_v4  ;;  %v134_v4 = vld [vmem:[%s2505_s2 + $0x10] sm:$0xff] }
  0xa2   :  { %403 = vmatmul.f32.gmra.mxu0 %v187_v21  ;;  %v227_v21 = vmul.f32 %v179_v18, %v1865_v17  ;;  %v182_v36 = vmul.f32 %v134_v4, %v1848_v9 }
  0xa8   :  { %1375 = vmatmul.msk.f32.gmra.mxu1 %vm56_vm0, %v200_v23  ;;  %v217_v23 = vmul.f32 %v169_v20, %v1841_v5 }
  0xa9   :  { %341 = vmatmul.f32.gmra.mxu3 %v189_v26  ;;  %v219_v26 = vmul.f32 %v171_v24, %v1853_v11 }
  0xaa   :  { %406 = vmatmul.f32.gmra.mxu0 %v190_v27  ;;  %v220_v27 = vmul.f32 %v172_v25, %v1855_v12 }
  0xb0   :  { %1376 = vmatmul.msk.f32.gmra.mxu1 %vm56_vm0, %v203_v29  ;;  %v175_v29 = vld [vmem:[%s2505_s2 + $0x158] sm:$0xff] }
  0xb1   :  { %344 = vmatmul.f32.gmra.mxu3 %v192_v32  ;;  %v223_v31 = vmul.f32 %v175_v29, %v1841_v5  ;;  %v177_v32 = vld [vmem:[%s2505_s2 + $0x168] sm:$0xff] }
  0xb2   :  { %409 = vmatmul.f32.gmra.mxu0 %v193_v33  ;;  %v178_v33 = vld [vmem:[%s2505_s2 + $0x170] sm:$0xff]  ;;  %v225_v34 = vmul.f32 %v177_v32, %v1853_v11  ;;  %v137_v11 = vld [vmem:[%s2505_s2 + $0x28] sm:$0xff] }
  0xb8   :  { %1377 = vmatmul.msk.f32.gmra.mxu1 %vm56_vm0, %v206_v35  ;;  %v226_v35 = vmul.f32 %v178_v33, %v1855_v12  ;;  %v185_v12 = vmul.f32 %v137_v11, %v1865_v17 }
  0xb9   :  { %347 = vmatmul.f32.gmra.mxu3 %v195_v38 }
  0xba   :  { %412 = vmatmul.f32.gmra.mxu0 %v196_v39 }
  0xc0   :  { %1378 = vmatmul.msk.f32.gmra.mxu1 %vm56_vm0, %v209_v41 }
  0xc1   :  { %350 = vmatmul.f32.gmra.mxu3 %v198_v44  ;;  %v143_v44 = vld [vmem:[%s2505_s2 + $0x58] sm:$0xff] }
  0xc2   :  { %415 = vmatmul.f32.gmra.mxu0 %v199_v45  ;;  %v191_v46 = vmul.f32 %v143_v44, %v1865_v17 }
  0xc8   :  { %1379 = vmatmul.msk.f32.gmra.mxu1 %vm56_vm0, %v212_v49 }
  0xc9   :  { %353 = vmatmul.f32.gmra.mxu3 %v201_v50  ;;  %v146_v50 = vld [vmem:[%s2505_s2 + $0x70] sm:$0xff]  ;;  %s1579_s2 = smov 120  }
  0xca   :  { %418 = vmatmul.f32.gmra.mxu0 %v202_v51  ;;  %v194_v52 = vmul.f32 %v146_v50, %v1848_v9 }
  0xd0   :  { %1380 = vmatmul.msk.f32.gmra.mxu1 %vm56_vm0, %v215_v55 }
  0xd1   :  { %356 = vmatmul.f32.gmra.mxu3 %v204_v56 }
  0xd2   :  { %421 = vmatmul.f32.gmra.mxu0 %v205_v57 }
  0xd8   :  { %1381 = vmatmul.msk.f32.gmra.mxu1 %vm56_vm0, %v218_v61 }
  0xd9   :  { %359 = vmatmul.f32.gmra.mxu3 %v207_v62 }
  0xda   :  { %424 = vmatmul.f32.gmra.mxu0 %v208_v63 }
  0xe0   :  { %1382 = vmatmul.msk.f32.gmra.mxu1 %vm56_vm0, %v221_v3 }
  0xe1   :  { %362 = vmatmul.f32.gmra.mxu3 %v210_v6 }
  0xe2   :  { %427 = vmatmul.f32.gmra.mxu0 %v211_v7 }
  0xe8   :  { %1383 = vmatmul.msk.f32.gmra.mxu1 %vm56_vm0, %v224_v14 }
  0xe9   :  { %365 = vmatmul.f32.gmra.mxu3 %v213_v15 }
  0xea   :  { %430 = vmatmul.f32.gmra.mxu0 %v214_v16 }
  0xf0   :  { %1384 = vmatmul.msk.f32.gmra.mxu1 %vm56_vm0, %v227_v21 }
  0xf1   :  { %368 = vmatmul.f32.gmra.mxu3 %v216_v22 }
  0xf2   :  { %433 = vmatmul.f32.gmra.mxu0 %v217_v23 }
  0xf9   :  { %371 = vmatmul.f32.gmra.mxu3 %v219_v26 }
  0xfa   :  { %436 = vmatmul.f32.gmra.mxu0 %v220_v27 }
 0x101   :  { %374 = vmatmul.f32.gmra.mxu3 %v222_v30 }
 0x102   :  { %439 = vmatmul.f32.gmra.mxu0 %v223_v31 }
 0x109   :  { %377 = vmatmul.f32.gmra.mxu3 %v225_v34 }
 0x10a   :  { %442 = vmatmul.f32.gmra.mxu0 %v226_v35 }
 0x10f   :  { %v2031_v5 = vpop.f32.mrf.mxu0 }
 0x112   :  { %1369 = vmatmul.msk.f32.vlgmr.msra.gmra.mxu0 %vm56_vm0, %v182_v36 }
 0x114   :  { %v2035_v37 = vpop.f32.mrf.mxu3 }
 0x117   :  { %v2040_v38 = vpop.f32.mrf.mxu0 }
 0x11a   :  { %1370 = vmatmul.msk.f32.gmra.mxu0 %vm56_vm0, %v185_v12 }
 0x11c   :  { %v2044_v39 = vpop.f32.mrf.mxu3 }
 0x11d   :  { %v2059_v47 = vpop.f32.mrf.mxu1 }
 0x11f   :  { %v2049_v41 = vpop.f32.mrf.mxu0 }
 0x122   :  { %1371 = vmatmul.msk.f32.gmra.mxu0 %vm56_vm0, %v188_v42 }
 0x124   :  { %v2053_v43 = vpop.f32.mrf.mxu3 }
 0x125   :  { %v2069_v53 = vpop.f32.mrf.mxu1 }
 0x127   :  { %v407_v45 = vpop.f32.mrf.mxu0 }
 0x12a   :  { %1372 = vmatmul.msk.f32.gmra.mxu0 %vm56_vm0, %v191_v46 }
 0x12c   :  { %v342_v48 = vpop.f32.mrf.mxu3 }
 0x12d   :  { %v2062_v49 = vadd.f32 %v407_v45, %v342_v48  ;;  %v484_v58 = vpop.f32.mrf.mxu1 }
 0x12f   :  { %v410_v51 = vpop.f32.mrf.mxu0 }
 0x132   :  { %1373 = vmatmul.msk.f32.gmra.mxu0 %vm56_vm0, %v194_v52 }
 0x134   :  { %v345_v54 = vpop.f32.mrf.mxu3 }
 0x135   :  { %v2071_v17 = vadd.f32 %v410_v51, %v345_v54  ;;  %v487_v63 = vpop.f32.mrf.mxu1 }
 0x137   :  { %v413_v55 = vpop.f32.mrf.mxu0 }
 0x13c   :  { %v348_v56 = vpop.f32.mrf.mxu3 }
 0x13d   :  { %v414_v57 = vadd.f32 %v413_v55, %v348_v56  ;;  %v490_v9 = vpop.f32.mrf.mxu1  ;;  %v405_v55 = vadd.f32 %v2049_v41, %v2053_v43 }
 0x13f   :  { %v416_v59 = vpop.f32.mrf.mxu0  ;;  %v2106_v51 = vadd.f32 %v2059_v47, %v414_v57 }
 0x144   :  { %v351_v60 = vpop.f32.mrf.mxu3 }
 0x145   :  { %v2073_v61 = vadd.f32 %v416_v59, %v351_v60  ;;  %v493_v6 = vpop.f32.mrf.mxu1 }
 0x147   :  { %v419_v62 = vpop.f32.mrf.mxu0  ;;  %v2124_v47 = vadd.f32 %v2069_v53, %v2073_v61  ;;  %v399_v53 = vadd.f32 %v2031_v5, %v2035_v37  ;;  %v402_v61 = vadd.f32 %v2040_v38, %v2044_v39 }
 0x14c   :  { %v354_v0 = vpop.f32.mrf.mxu3 }
 0x14d   :  { %v496_v15 = vpop.f32.mrf.mxu1  ;;  %v420_v28 = vadd.f32 %v419_v62, %v354_v0 }
 0x14f   :  { %v422_v1 = vpop.f32.mrf.mxu0  ;;  %v2085_v31 = vadd.f32 %v484_v58, %v420_v28 }
 0x151   :  { %v1467_v37 = vpack.i.bf16 %v2124_v47, %v2085_v31 }
 0x154   :  { %v357_v2 = vpop.f32.mrf.mxu3 }
 0x155   :  { %v499_v22 = vpop.f32.mrf.mxu1  ;;  %v423_v12 = vadd.f32 %v422_v1, %v357_v2 }
 0x157   :  { %v425_v3 = vpop.f32.mrf.mxu0  ;;  %v2097_v45 = vadd.f32 %v487_v63, %v423_v12 }
 0x15c   :  { %v360_v7 = vpop.f32.mrf.mxu3 }
 0x15d   :  { %v426_v8 = vadd.f32 %v425_v3, %v360_v7  ;;  %v502_v27 = vpop.f32.mrf.mxu1 }
 0x15f   :  { %v2075_v10 = vadd.f32 %v490_v9, %v426_v8  ;;  %v428_v13 = vpop.f32.mrf.mxu0 }
 0x164   :  { %v363_v14 = vpop.f32.mrf.mxu3 }
 0x165   :  { %v429_v23 = vadd.f32 %v428_v13, %v363_v14  ;;  %v505_v35 = vpop.f32.mrf.mxu1 }
 0x167   :  { %v431_v16 = vpop.f32.mrf.mxu0  ;;  %v2081_v25 = vadd.f32 %v493_v6, %v429_v23 }
 0x16c   :  { %v366_v18 = vpop.f32.mrf.mxu3 }
 0x16d   :  { %v432_v19 = vadd.f32 %v431_v16, %v366_v18  ;;  %v508_v44 = vpop.f32.mrf.mxu1 }
 0x16f   :  { %v2077_v20 = vadd.f32 %v496_v15, %v432_v19  ;;  %v434_v21 = vpop.f32.mrf.mxu0 }
 0x171   :  { %565 = vrot.lane.b32.xlu2 %v2077_v20, %s1579_s2  ;;  %v1457_v63 = vpack.i.bf16 %v2081_v25, %v2077_v20 }
 0x174   :  { %v369_v24 = vpop.f32.mrf.mxu3 }
 0x175   :  { %v435_v34 = vadd.f32 %v434_v21, %v369_v24 }
 0x177   :  { %v437_v26 = vpop.f32.mrf.mxu0  ;;  %v2093_v36 = vadd.f32 %v499_v22, %v435_v34 }
 0x179   :  { %563 = vrot.lane.b32.xlu2 %v2081_v25, %s1579_s2 }
 0x17c   :  { %v372_v29 = vpop.f32.mrf.mxu3 }
 0x17d   :  { %v438_v30 = vadd.f32 %v437_v26, %v372_v29 }
 0x17f   :  { %v2087_v32 = vadd.f32 %v502_v27, %v438_v30  ;;  %v440_v33 = vpop.f32.mrf.mxu0 }
 0x181   :  { %557 = vrot.lane.b32.xlu2 %v2085_v31, %s1579_s2  ;;  %569 = vrot.lane.b32.xlu1 %v2087_v32, %s1579_s2  ;;  %v1452_v59 = vpack.i.bf16 %v2093_v36, %v2087_v32 }
 0x184   :  { %v375_v4 = vpop.f32.mrf.mxu3 }
 0x185   :  { %v441_v50 = vadd.f32 %v440_v33, %v375_v4 }
 0x187   :  { %v443_v11 = vpop.f32.mrf.mxu0  ;;  %v2108_v52 = vadd.f32 %v505_v35, %v441_v50 }
 0x189   :  { %567 = vrot.lane.b32.xlu1 %v2093_v36, %s1579_s2 }
 0x18c   :  { %v378_v40 = vpop.f32.mrf.mxu3 }
 0x18d   :  { %v444_v42 = vadd.f32 %v443_v11, %v378_v40  ;;  %v514_v11 = vld [vmem:[%s2507_s4 + $0x18] sm:$0xff] }
 0x18f   :  { %v2099_v46 = vadd.f32 %v508_v44, %v444_v42  ;;  %v463_v48 = vpop.f32.mrf.mxu0  ;;  %v1462_v42 = vpack.i.bf16 %v2097_v45, %v2075_v10 }
 0x190   :  { %v2145_v62 = vadd.f32 %v463_v48, %v399_v53 }
 0x191   :  { %559 = vrot.lane.b32.xlu1 %v2097_v45, %s1579_s2  ;;  %573 = vrot.lane.b32.xlu0 %v2099_v46, %s1579_s2 }
 0x197   :  { %v466_v54 = vpop.f32.mrf.mxu0 }
 0x199   :  { %553 = vrot.lane.b32.xlu1 %v2106_v51, %s1579_s2  ;;  %571 = vrot.lane.b32.xlu0 %v2108_v52, %s1579_s2 }
 0x19f   :  { %v469_v56 = vpop.f32.mrf.mxu0 }
 0x1a0   :  { %v2116_v58 = vadd.f32 %v469_v56, %v405_v55  ;;  %v515_v55 = vld [vmem:[%s2507_s4 + $0x20] sm:$0xff] }
 0x1a1   :  { %561 = vrot.lane.b32.xlu0 %v2075_v10, %s1579_s2 }
 0x1a2   :  { %547 = vrot.lane.b32.xlu1 %v2116_v58, %s1579_s2 }
 0x1a7   :  { %v472_v57 = vpop.f32.mrf.mxu0 }
 0x1a8   :  { %v2132_v41 = vadd.f32 %v472_v57, %v2062_v49  ;;  %v2147_v49 = vadd.f32 %v466_v54, %v402_v61  ;;  %v518_v57 = vld [vmem:[%s2507_s4 + $0x38] sm:$0xff] }
 0x1a9   :  { %555 = vrot.lane.b32.xlu0 %v2124_v47, %s1579_s2 }
 0x1aa   :  { %1453 = vrot.lane.b32.xlu1 %v1452_v59, %s1580_s23 }
 0x1af   :  { %v475_v43 = vpop.f32.mrf.mxu0 }
 0x1b0   :  { %v2135_v60 = vadd.f32 %v475_v43, %v2071_v17  ;;  %v1447_v17 = vpack.i.bf16 %v2108_v52, %v2099_v46 }
 0x1b1   :  { %549 = vrot.lane.b32.xlu0 %v2132_v41, %s1579_s2 }
 0x1b2   :  { %551 = vrot.lane.b32.xlu2 %v2135_v60, %s1579_s2  ;;  %v1472_v5 = vpack.i.bf16 %v2135_v60, %v2106_v51 }
 0x1b9   :  { %543 = vrot.lane.b32.xlu0 %v2145_v62, %s1579_s2 }
 0x1ba   :  { %545 = vrot.lane.b32.xlu2 %v2147_v49, %s1579_s2  ;;  %s1582_s2 = smov 128  }
 0x1c1   :  { %1448 = vrot.lane.b32.xlu0 %v1447_v17, %s1580_s23  ;;  %v521_v17 = vld [vmem:[%s2507_s4 + $0x50] sm:$0xff] }
 0x1c2   :  { %1458 = vrot.lane.b32.xlu2 %v1457_v63, %s1580_s23 }
 0x1c9   :  { %1473 = vrot.lane.b32.xlu0 %v1472_v5, %s1580_s23  ;;  %v523_v5 = vld [vmem:[%s2507_s4 + $0x60] sm:$0xff] }
 0x1ca   :  { %1468 = vrot.lane.b32.xlu2 %v1467_v37, %s1580_s23 }
 0x1cb   :  { %v566_v0 = vpop.permute.xlu2 %565 }
 0x1d3   :  { %v564_v2 = vpop.permute.xlu2 %563 }
 0x1db   :  { %v558_v8 = vpop.permute.xlu2 %557 }
 0x1f3   :  { %v570_v38 = vpop.permute.xlu1 %569 }
 0x1fb   :  { %v568_v9 = vpop.permute.xlu1 %567 }
 0x203   :  { %v574_v39 = vpop.permute.xlu0 %573  ;;  %v560_v6 = vpop.permute.xlu1 %559 }
 0x204   :  { %1385 = vmatpush.xpose.msk.msrb.mxu2 %vm575_vm1, %v574_v39 }
 0x20b   :  { %v572_v1 = vpop.permute.xlu0 %571  ;;  %v554_v13 = vpop.permute.xlu1 %553 }
 0x20c   :  { %1386 = vmatpush.xpose.msk.msrb.mxu2 %vm575_vm1, %v572_v1  ;;  %v552_v15 = vpop.permute.xlu2 %551 }
 0x210   :  { %1387 = vmatpush.xpose.msk.msrb.mxu2 %vm575_vm1, %v570_v38 }
 0x213   :  { %v562_v3 = vpop.permute.xlu0 %561 }
 0x214   :  { %1388 = vmatpush.xpose.msk.msrb.mxu2 %vm575_vm1, %v568_v9  ;;  %v548_v16 = vpop.permute.xlu1 %547  ;;  %v546_v19 = vpop.permute.xlu2 %545 }
 0x218   :  { %1389 = vmatpush.xpose.msk.msrb.mxu2 %vm575_vm1, %v566_v0 }
 0x21b   :  { %v556_v7 = vpop.permute.xlu0 %555 }
 0x21c   :  { %1390 = vmatpush.xpose.msk.msrb.mxu2 %vm575_vm1, %v564_v2  ;;  %v1454_v23 = vpop.permute.xlu1 %1453  ;;  %v1459_v27 = vpop.permute.xlu2 %1458 }
 0x21d   :  { %v1455_v26 = vunpack.i.l.bf16 %v1454_v23  ;;  %v1456_v28 = vunpack.i.h.bf16 %v1454_v23  ;;  %v1460_v29 = vunpack.i.l.bf16 %v1459_v27  ;;  %v1461_v30 = vunpack.i.h.bf16 %v1459_v27 }
 0x220   :  { %1391 = vmatpush.xpose.msk.msrb.mxu2 %vm575_vm1, %v562_v3 }
 0x223   :  { %v550_v14 = vpop.permute.xlu0 %549 }
 0x224   :  { %1392 = vmatpush.xpose.msk.msrb.mxu2 %vm575_vm1, %v560_v6  ;;  %v1469_v39 = vpop.permute.xlu2 %1468 }
 0x225   :  { %v1470_v27 = vunpack.i.l.bf16 %v1469_v39 }
 0x228   :  { %1393 = vmatpush.xpose.msk.msrb.mxu2 %vm575_vm1, %v558_v8 }
 0x22b   :  { %v544_v18 = vpop.permute.xlu0 %543 }
 0x22c   :  { %1394 = vmatpush.xpose.msk.msrb.mxu2 %vm575_vm1, %v556_v7 }
 0x230   :  { %1395 = vmatpush.xpose.msk.msrb.mxu2 %vm575_vm1, %v554_v13 }
 0x233   :  { %v1449_v21 = vpop.permute.xlu0 %1448 }
 0x234   :  { %v1450_v22 = vunpack.i.l.bf16 %v1449_v21  ;;  %1396 = vmatpush.xpose.msk.msrb.mxu2 %vm575_vm1, %v552_v15  ;;  %v1451_v24 = vunpack.i.h.bf16 %v1449_v21 }
 0x236   :  { %1105 = vmatpush.msra.mxu1 %v1450_v22 }
 0x238   :  { %1397 = vmatpush.xpose.msk.msrb.mxu2 %vm575_vm1, %v550_v14  ;;  %1106 = vmatpush.msra.mxu1 %v1451_v24 }
 0x23a   :  { %1107 = vmatpush.msra.mxu1 %v1455_v26 }
 0x23b   :  { %v1474_v2 = vpop.permute.xlu0 %1473 }
 0x23c   :  { %1398 = vmatpush.xpose.msk.msrb.mxu2 %vm575_vm1, %v548_v16  ;;  %1108 = vmatpush.msra.mxu1 %v1456_v28  ;;  %v1477_v28 = vpack.i.bf16 %v2116_v58, %v2132_v41 }
 0x23e   :  { %1109 = vmatpush.msra.mxu1 %v1460_v29  ;;  %v1471_v29 = vunpack.i.h.bf16 %v1469_v39 }
 0x240   :  { %1399 = vmatpush.xpose.msk.msrb.mxu2 %vm575_vm1, %v546_v19  ;;  %1110 = vmatpush.msra.mxu1 %v1461_v30  ;;  %v1475_v30 = vunpack.i.l.bf16 %v1474_v2 }
 0x244   :  { %1400 = vmatpush.xpose.msk.msrb.mxu2 %vm575_vm1, %v544_v18 }
 0x247   :  { %1401 = vmatmul.msk.f32.vlgmr.msrb.gmra.mxu2 %vm575_vm1, %v2145_v62 }
 0x24f   :  { %1402 = vmatmul.msk.f32.gmra.mxu2 %vm575_vm1, %v2147_v49 }
 0x257   :  { %1403 = vmatmul.msk.f32.gmra.mxu2 %vm575_vm1, %v2116_v58 }
 0x25f   :  { %1404 = vmatmul.msk.f32.gmra.mxu2 %vm575_vm1, %v2132_v41 }
 0x267   :  { %1405 = vmatmul.msk.f32.gmra.mxu2 %vm575_vm1, %v2135_v60  ;;  %v519_v60 = vld [vmem:[%s2507_s4 + $0x40] sm:$0xff] }
 0x26f   :  { %1406 = vmatmul.msk.f32.gmra.mxu2 %vm575_vm1, %v2106_v51  ;;  %v517_v51 = vld [vmem:[%s2507_s4 + $0x30] sm:$0xff] }
 0x277   :  { %1407 = vmatmul.msk.f32.gmra.mxu2 %vm575_vm1, %v2124_v47 }
 0x27f   :  { %1408 = vmatmul.msk.f32.gmra.mxu2 %vm575_vm1, %v2085_v31  ;;  %v511_v31 = vld [vmem:[%s2507_s4] sm:$0xff] }
 0x287   :  { %1409 = vmatmul.msk.f32.gmra.mxu2 %vm575_vm1, %v2097_v45 }
 0x28f   :  { %1410 = vmatmul.msk.f32.gmra.mxu2 %vm575_vm1, %v2075_v10 }
 0x297   :  { %1411 = vmatmul.msk.f32.gmra.mxu2 %vm575_vm1, %v2081_v25 }
 0x29f   :  { %1412 = vmatmul.msk.f32.gmra.mxu2 %vm575_vm1, %v2077_v20  ;;  %v512_v20 = vld [vmem:[%s2507_s4 + $0x8] sm:$0xff] }
 0x2a7   :  { %1413 = vmatmul.msk.f32.gmra.mxu2 %vm575_vm1, %v2093_v36 }
 0x2af   :  { %1414 = vmatmul.msk.f32.gmra.mxu2 %vm575_vm1, %v2087_v32  ;;  %v513_v32 = vld [vmem:[%s2507_s4 + $0x10] sm:$0xff] }
 0x2b7   :  { %1415 = vmatmul.msk.f32.gmra.mxu2 %vm575_vm1, %v2108_v52 }
 0x2bf   :  { %1416 = vmatmul.msk.f32.gmra.mxu2 %vm575_vm1, %v2099_v46  ;;  %v516_v46 = vld [vmem:[%s2507_s4 + $0x28] sm:$0xff] }
 0x2ca   :  { %v657_v25 = vpop.f32.mrf.mxu2 }
 0x2cb   :  { %v658_v33 = vadd.f32 %v657_v25, %v511_v31  ;;  %v1476_v25 = vunpack.i.h.bf16 %v1474_v2 }
 0x2cd   :  { %705 = vmax.xlane.f32.xlu1 %v658_v33 }
 0x2d2   :  { %v660_v34 = vpop.f32.mrf.mxu2 }
 0x2d3   :  { %v661_v35 = vadd.f32 %v660_v34, %v512_v20  ;;  %v520_v34 = vld [vmem:[%s2507_s4 + $0x48] sm:$0xff] }
 0x2d5   :  { %707 = vmax.xlane.f32.xlu2 %v661_v35 }
 0x2da   :  { %v663_v4 = vpop.f32.mrf.mxu2 }
 0x2db   :  { %v664_v36 = vadd.f32 %v663_v4, %v513_v32 }
 0x2dd   :  { %709 = vmax.xlane.f32.xlu0 %v664_v36 }
 0x2e2   :  { %v666_v12 = vpop.f32.mrf.mxu2 }
 0x2e3   :  { %v667_v40 = vadd.f32 %v666_v12, %v514_v11 }
 0x2e5   :  { %711 = vmax.xlane.f32.xlu2 %v667_v40 }
 0x2e6   :  { %1463 = vrot.lane.b32.xlu1 %v1462_v42, %s1580_s23 }
 0x2ea   :  { %v669_v44 = vpop.f32.mrf.mxu2 }
 0x2eb   :  { %v2243_v56 = vadd.f32 %v669_v44, %v515_v55 }
 0x2f2   :  { %v672_v48 = vpop.f32.mrf.mxu2 }
 0x2f3   :  { %v2231_v50 = vadd.f32 %v672_v48, %v516_v46 }
 0x2f5   :  { %715 = vmax.xlane.f32.xlu2 %v2231_v50 }
 0x2fa   :  { %v675_v52 = vpop.f32.mrf.mxu2 }
 0x2fb   :  { %v2237_v54 = vadd.f32 %v675_v52, %v517_v51  ;;  %v525_v52 = vld [vmem:[%s2507_s4 + $0x70] sm:$0xff] }
 0x2fd   :  { %717 = vmax.xlane.f32.xlu2 %v2237_v54 }
 0x302   :  { %v678_v10 = vpop.f32.mrf.mxu2 }
 0x303   :  { %v2251_v59 = vadd.f32 %v678_v10, %v518_v57 }
 0x30a   :  { %v681_v45 = vpop.f32.mrf.mxu2 }
 0x30b   :  { %v2257_v53 = vadd.f32 %v681_v45, %v519_v60 }
 0x310   :  { %713 = vmax.xlane.f32.xlu1 %v2243_v56 }
 0x312   :  { %v2246_v47 = vpop.f32.mrf.mxu2 }
 0x313   :  { %v2297_v32 = vadd.f32 %v2246_v47, %v520_v34  ;;  %v526_v47 = vld [vmem:[%s2507_s4 + $0x78] sm:$0xff] }
 0x318   :  { %719 = vmax.xlane.f32.xlu1 %v2251_v59 }
 0x31a   :  { %v687_v43 = vpop.f32.mrf.mxu2 }
 0x31b   :  { %v2265_v63 = vadd.f32 %v687_v43, %v521_v17 }
 0x320   :  { %721 = vmax.xlane.f32.xlu1 %v2257_v53 }
 0x322   :  { %v2260_v61 = vpop.f32.mrf.mxu2 }
 0x328   :  { %725 = vmax.xlane.f32.xlu1 %v2265_v63 }
 0x32a   :  { %v693_v37 = vpop.f32.mrf.mxu2 }
 0x32b   :  { %v2271_v38 = vadd.f32 %v693_v37, %v523_v5 }
 0x330   :  { %729 = vmax.xlane.f32.xlu1 %v2271_v38 }
 0x340   :  { %v706_v0 = vpop.xlane.xlu1 %705 }
 0x341   :  { %v737_v1 = vsub.f32 %v658_v33, %v706_v0  ;;  %v1482_v33 = vpack.i.bf16 %v2145_v62, %v2147_v49  ;;  %v524_v49 = vld [vmem:[%s2507_s4 + $0x68] sm:$0xff] }
 0x343   :  { %v753_v9 = vmul.f32 1.442695, %v737_v1 }
 0x345   :  { %1487 = vpow2.f32 %v753_v9 }
 0x348   :  { %v708_v3 = vpop.xlane.xlu2 %707 }
 0x349   :  { %v738_v6 = vsub.f32 %v661_v35, %v708_v3 }
 0x34b   :  { %v2274_v7 = vpop.eup %1487  ;;  %v755_v8 = vmul.f32 1.442695, %v738_v6 }
 0x34c   :  { %785 = vadd.xlane.f32.xlu0 %v2274_v7 }
 0x34d   :  { %1489 = vpow2.f32 %v755_v8 }
 0x350   :  { %v710_v13 = vpop.xlane.xlu0 %709 }
 0x351   :  { %v739_v14 = vsub.f32 %v664_v36, %v710_v13  ;;  %v696_v36 = vpop.f32.mrf.mxu2 }
 0x352   :  { %v2310_v42 = vadd.f32 %v696_v36, %v524_v49 }
 0x353   :  { %v2277_v15 = vpop.eup %1489  ;;  %v757_v16 = vmul.f32 1.442695, %v739_v14 }
 0x354   :  { %787 = vadd.xlane.f32.xlu2 %v2277_v15 }
 0x355   :  { %1491 = vpow2.f32 %v757_v16 }
 0x358   :  { %v712_v18 = vpop.xlane.xlu2 %711  ;;  %v1464_v19 = vpop.permute.xlu1 %1463 }
 0x359   :  { %v740_v21 = vsub.f32 %v667_v40, %v712_v18  ;;  %v1465_v22 = vunpack.i.l.bf16 %v1464_v19  ;;  %v1466_v26 = vunpack.i.h.bf16 %v1464_v19  ;;  %v522_v40 = vld [vmem:[%s2507_s4 + $0x58] sm:$0xff] }
 0x35a   :  { %v2315_v48 = vadd.f32 %v2260_v61, %v522_v40 }
 0x35b   :  { %v2280_v23 = vpop.eup %1491  ;;  %v759_v24 = vmul.f32 1.442695, %v740_v21  ;;  %1111 = vmatpush.msra.mxu1 %v1465_v22 }
 0x35c   :  { %789 = vadd.xlane.f32.xlu1 %v2280_v23 }
 0x35d   :  { %1493 = vpow2.f32 %v759_v24  ;;  %1112 = vmatpush.msra.mxu1 %v1466_v26 }
 0x35f   :  { %1113 = vmatpush.msra.mxu1 %v1470_v27 }
 0x360   :  { %1478 = vrot.lane.b32.xlu0 %v1477_v28, %s1580_s23 }
 0x361   :  { %1114 = vmatpush.msra.mxu1 %v1471_v29 }
 0x363   :  { %v2286_v31 = vpop.eup %1493  ;;  %1115 = vmatpush.msra.mxu1 %v1475_v30 }
 0x364   :  { %791 = vadd.xlane.f32.xlu1 %v2286_v31 }
 0x365   :  { %1116 = vmatpush.msra.mxu1 %v1476_v25 }
 0x368   :  { %v716_v20 = vpop.xlane.xlu2 %715 }
 0x369   :  { %v742_v4 = vsub.f32 %v2231_v50, %v716_v20  ;;  %v699_v50 = vpop.f32.mrf.mxu2 }
 0x36a   :  { %v2324_v45 = vadd.f32 %v699_v50, %v525_v52 }
 0x36b   :  { %v763_v62 = vmul.f32 1.442695, %v742_v4 }
 0x36c   :  { %1483 = vrot.lane.b32.xlu2 %v1482_v33, %s1580_s23  ;;  %s1583_s23 = smov 8  }
 0x370   :  { %v718_v11 = vpop.xlane.xlu2 %717 }
 0x371   :  { %v743_v44 = vsub.f32 %v2237_v54, %v718_v11  ;;  %v702_v57 = vpop.f32.mrf.mxu2 }
 0x372   :  { %v2334_v60 = vadd.f32 %v702_v57, %v526_v47 }
 0x373   :  { %v765_v51 = vmul.f32 1.442695, %v743_v44 }
 0x383   :  { %v714_v58 = vpop.xlane.xlu1 %713 }
 0x384   :  { %v741_v41 = vsub.f32 %v2243_v56, %v714_v58 }
 0x386   :  { %v761_v35 = vmul.f32 1.442695, %v741_v41 }
 0x388   :  { %1495 = vpow2.f32 %v761_v35 }
 0x389   :  { %1497 = vpow2.f32 %v763_v62 }
 0x38a   :  { %723 = vmax.xlane.f32.xlu0 %v2297_v32  ;;  %1499 = vpow2.f32 %v765_v51 }
 0x38b   :  { %v720_v46 = vpop.xlane.xlu1 %719 }
 0x38c   :  { %v744_v54 = vsub.f32 %v2251_v59, %v720_v46 }
 0x38e   :  { %v2304_v12 = vpop.eup %1495  ;;  %v767_v56 = vmul.f32 1.442695, %v744_v54 }
 0x38f   :  { %793 = vadd.xlane.f32.xlu1 %v2304_v12  ;;  %v2321_v10 = vpop.eup %1497 }
 0x390   :  { %v2331_v43 = vpop.eup %1499  ;;  %1501 = vpow2.f32 %v767_v56 }
 0x392   :  { %731 = vmax.xlane.f32.xlu0 %v2310_v42 }
 0x393   :  { %v722_v55 = vpop.xlane.xlu1 %721 }
 0x394   :  { %v745_v61 = vsub.f32 %v2257_v53, %v722_v55 }
 0x395   :  { %727 = vmax.xlane.f32.xlu2 %v2315_v48 }
 0x396   :  { %v769_v59 = vmul.f32 1.442695, %v745_v61  ;;  %v2338_v5 = vpop.eup %1501 }
 0x397   :  { %795 = vadd.xlane.f32.xlu1 %v2321_v10 }
 0x398   :  { %1503 = vpow2.f32 %v769_v59 }
 0x39a   :  { %733 = vmax.xlane.f32.xlu0 %v2324_v45 }
 0x39b   :  { %v726_v17 = vpop.xlane.xlu1 %725 }
 0x39c   :  { %v747_v37 = vsub.f32 %v2265_v63, %v726_v17 }
 0x39e   :  { %v773_v39 = vmul.f32 1.442695, %v747_v37  ;;  %v2342_v0 = vpop.eup %1503 }
 0x39f   :  { %797 = vadd.xlane.f32.xlu1 %v2331_v43 }
 0x3a0   :  { %1505 = vpow2.f32 %v773_v39 }
 0x3a2   :  { %735 = vmax.xlane.f32.xlu0 %v2334_v60 }
 0x3a3   :  { %v2348_v2 = vpop.xlane.xlu1 %729 }
 0x3a6   :  { %v2345_v1 = vpop.eup %1505 }
 0x3a7   :  { %799 = vadd.xlane.f32.xlu1 %v2338_v5 }
 0x3af   :  { %801 = vadd.xlane.f32.xlu1 %v2342_v0 }
 0x3b7   :  { %805 = vadd.xlane.f32.xlu1 %v2345_v1 }
 0x3bf   :  { %v786_v53 = vpop.xlane.xlu0 %785 }
 0x3c0   :  { %1507 = vrcp.f32 %v786_v53  ;;  %v828_v19 = vand.u32 2147483648, %v786_v53  ;;  %vm822_vm3 = vweird.f32 %v786_v53  ;;  %v826_v22 = vand.u32 2147483647, %v786_v53 }
 0x3c2   :  { %v829_v30 = vor.u32 1.1754944e-38, %v828_v19  ;;  %vm827_vm5 = vcmp.eq.f32.partialorder %v826_v22, 8.507059e+37 }
 0x3c6   :  { %v1508_v9 = vpop.eup %1507 }
 0x3c7   :  { %v818_v3 = vmul.f32 %v1508_v9, %v786_v53  ;;  %v788_v6 = vpop.xlane.xlu2 %787  ;;  %vm823_vm2 = vweird.f32 %v1508_v9 }
 0x3c8   :  { %1509 = vrcp.f32 %v788_v6  ;;  %vm824_vm4 = vmor %vm822_vm3, %vm823_vm2  ;;  %v843_v62 = vand.u32 2147483648, %v788_v6  ;;  %vm837_vm7 = vweird.f32 %v788_v6  ;;  %v841_v11 = vand.u32 2147483647, %v788_v6 }
 0x3c9   :  { %v819_v8 = vsub.f32 1.0, %v818_v3 }
 0x3ca   :  { %v844_v46 = vor.u32 1.1754944e-38, %v843_v62  ;;  %vm842_vm9 = vcmp.eq.f32.partialorder %v841_v11, 8.507059e+37 }
 0x3cb   :  { %v820_v63 = vmul.f32 %v1508_v9, %v819_v8 }
 0x3cd   :  { %v821_v18 = vadd.f32 %v1508_v9, %v820_v63 }
 0x3ce   :  { %v1510_v13 = vpop.eup %1509 }
 0x3cf   :  { %v833_v14 = vmul.f32 %v1510_v13, %v788_v6  ;;  %v790_v16 = vpop.xlane.xlu1 %789  ;;  %v1484_v28 = vpop.permute.xlu2 %1483  ;;  %v825_v29 = vsel %vm824_vm4, %v1508_v9, %v821_v18  ;;  %vm838_vm6 = vweird.f32 %v1510_v13 }
 0x3d0   :  { %1511 = vrcp.f32 %v790_v16  ;;  %v1485_v20 = vunpack.i.l.bf16 %v1484_v28  ;;  %v830_v34 = vsel %vm827_vm5, %v829_v30, %v825_v29  ;;  %v1486_v4 = vunpack.i.h.bf16 %v1484_v28  ;;  %vm839_vm8 = vmor %vm837_vm7, %vm838_vm6 }
 0x3d1   :  { %v834_v21 = vsub.f32 1.0, %v833_v14  ;;  %v831_v49 = vmul.f32 %v2274_v7, %v830_v34  ;;  %v858_v56 = vand.u32 2147483648, %v790_v16  ;;  %vm852_vm11 = vweird.f32 %v790_v16 }
 0x3d2   :  { %v1479_v24 = vpop.permute.xlu0 %1478  ;;  %v856_v7 = vand.u32 2147483647, %v790_v16 }
 0x3d3   :  { %v1480_v26 = vunpack.i.l.bf16 %v1479_v24  ;;  %v835_v27 = vmul.f32 %v1510_v13, %v834_v21  ;;  %v1481_v25 = vunpack.i.h.bf16 %v1479_v24  ;;  %v859_v59 = vor.u32 1.1754944e-38, %v858_v56 }
 0x3d4   :  { %vm857_vm13 = vcmp.eq.f32.partialorder %v856_v7, 8.507059e+37 }
 0x3d5   :  { %1117 = vmatpush.msra.mxu1 %v1480_v26  ;;  %v836_v35 = vadd.f32 %v1510_v13, %v835_v27 }
 0x3d6   :  { %v1512_v33 = vpop.eup %1511 }
 0x3d7   :  { %v848_v58 = vmul.f32 %v1512_v33, %v790_v16  ;;  %v792_v41 = vpop.xlane.xlu1 %791  ;;  %1118 = vmatpush.msra.mxu1 %v1481_v25  ;;  %v840_v44 = vsel %vm839_vm8, %v1510_v13, %v836_v35  ;;  %vm853_vm10 = vweird.f32 %v1512_v33  ;;  %v749_v16 = vsub.f32 %v2271_v38, %v2348_v2 }
 0x3d8   :  { %1513 = vrcp.f32 %v792_v41  ;;  %v845_v52 = vsel %vm842_vm9, %v844_v46, %v840_v44  ;;  %vm854_vm12 = vmor %vm852_vm11, %vm853_vm10  ;;  %v873_v39 = vand.u32 2147483648, %v792_v41  ;;  %vm867_vm15 = vweird.f32 %v792_v41 }
 0x3d9   :  { %v849_v36 = vsub.f32 1.0, %v848_v58  ;;  %1119 = vmatpush.msra.mxu1 %v1485_v20  ;;  %v846_v47 = vmul.f32 %v2277_v15, %v845_v52  ;;  %v871_v9 = vand.u32 2147483647, %v792_v41  ;;  %v777_v18 = vmul.f32 1.442695, %v749_v16 }
 0x3da   :  { %v874_v15 = vor.u32 1.1754944e-38, %v873_v39 }
 0x3db   :  { %1120 = vmatpush.msra.mxu1 %v1486_v4  ;;  %v850_v40 = vmul.f32 %v1512_v33, %v849_v36  ;;  %vm872_vm3 = vcmp.eq.f32.partialorder %v871_v9, 8.507059e+37 }
 0x3dc   :  { %1121 = vmatmul.f32.vlgmr.msra.gmra.mxu1 %v831_v49 }
 0x3dd   :  { %v851_v54 = vadd.f32 %v1512_v33, %v850_v40 }
 0x3de   :  { %v1514_v50 = vpop.eup %1513 }
 0x3df   :  { %v863_v51 = vmul.f32 %v1514_v50, %v792_v41  ;;  %v855_v61 = vsel %vm854_vm12, %v1512_v33, %v851_v54  ;;  %vm868_vm14 = vweird.f32 %v1514_v50 }
 0x3e0   :  { %v860_v17 = vsel %vm857_vm13, %v859_v59, %v855_v61  ;;  %vm869_vm2 = vmor %vm867_vm15, %vm868_vm14 }
 0x3e1   :  { %v864_v55 = vsub.f32 1.0, %v863_v51  ;;  %v861_v53 = vmul.f32 %v2280_v23, %v860_v17 }
 0x3e3   :  { %v865_v57 = vmul.f32 %v1514_v50, %v864_v55 }
 0x3e4   :  { %1124 = vmatmul.f32.gmra.mxu1 %v846_v47 }
 0x3e5   :  { %v866_v37 = vadd.f32 %v1514_v50, %v865_v57 }
 0x3e7   :  { %v870_v3 = vsel %vm869_vm2, %v1514_v50, %v866_v37 }
 0x3e8   :  { %v875_v6 = vsel %vm872_vm3, %v874_v15, %v870_v3 }
 0x3e9   :  { %v876_v8 = vmul.f32 %v2286_v31, %v875_v6 }
 0x3ec   :  { %1127 = vmatmul.f32.gmra.mxu1 %v861_v53 }
 0x3f4   :  { %1130 = vmatmul.f32.gmra.mxu1 %v876_v8 }
 0x3fd   :  { %v724_v63 = vpop.xlane.xlu0 %723 }
 0x3fe   :  { %v746_v13 = vsub.f32 %v2297_v32, %v724_v63 }
 0x400   :  { %v771_v14 = vmul.f32 1.442695, %v746_v13 }
 0x402   :  { %1515 = vpow2.f32 %v771_v14  ;;  %v794_v23 = vpop.xlane.xlu1 %793 }
 0x403   :  { %1517 = vrcp.f32 %v794_v23  ;;  %v888_v30 = vand.u32 2147483648, %v794_v23  ;;  %v886_v33 = vand.u32 2147483647, %v794_v23  ;;  %vm882_vm5 = vweird.f32 %v794_v23 }
 0x404   :  { %1519 = vpow2.f32 %v777_v18 }
 0x405   :  { %v732_v19 = vpop.xlane.xlu0 %731  ;;  %v889_v35 = vor.u32 1.1754944e-38, %v888_v30  ;;  %vm887_vm7 = vcmp.eq.f32.partialorder %v886_v33, 8.507059e+37 }
 0x406   :  { %v750_v21 = vsub.f32 %v2310_v42, %v732_v19 }
 0x408   :  { %v2358_v22 = vpop.eup %1515  ;;  %v779_v24 = vmul.f32 1.442695, %v750_v21  ;;  %v728_v26 = vpop.xlane.xlu2 %727 }
 0x409   :  { %v1518_v31 = vpop.eup %1517  ;;  %v748_v27 = vsub.f32 %v2315_v48, %v728_v26  ;;  %803 = vadd.xlane.f32.xlu2 %v2358_v22 }
 0x40a   :  { %v878_v32 = vmul.f32 %v1518_v31, %v794_v23  ;;  %1521 = vpow2.f32 %v779_v24  ;;  %v796_v38 = vpop.xlane.xlu1 %795  ;;  %vm883_vm4 = vweird.f32 %v1518_v31  ;;  %v2363_v20 = vpop.eup %1519 }
 0x40b   :  { %v775_v2 = vmul.f32 1.442695, %v748_v27  ;;  %1523 = vrcp.f32 %v796_v38  ;;  %vm884_vm6 = vmor %vm882_vm5, %vm883_vm4  ;;  %v903_v46 = vand.u32 2147483648, %v796_v38  ;;  %v901_v52 = vand.u32 2147483647, %v796_v38 }
 0x40c   :  { %v879_v28 = vsub.f32 1.0, %v878_v32  ;;  %vm897_vm9 = vweird.f32 %v796_v38 }
 0x40d   :  { %1525 = vpow2.f32 %v775_v2  ;;  %v734_v29 = vpop.xlane.xlu0 %733  ;;  %v904_v47 = vor.u32 1.1754944e-38, %v903_v46  ;;  %vm902_vm11 = vcmp.eq.f32.partialorder %v901_v52, 8.507059e+37 }
 0x40e   :  { %v880_v42 = vmul.f32 %v1518_v31, %v879_v28  ;;  %v751_v25 = vsub.f32 %v2324_v45, %v734_v29 }
 0x410   :  { %v2365_v58 = vpop.eup %1521  ;;  %v881_v48 = vadd.f32 %v1518_v31, %v880_v42  ;;  %v781_v34 = vmul.f32 1.442695, %v751_v25 }
 0x411   :  { %v1524_v41 = vpop.eup %1523  ;;  %809 = vadd.xlane.f32.xlu2 %v2363_v20  ;;  %811 = vadd.xlane.f32.xlu1 %v2365_v58 }
 0x412   :  { %v893_v4 = vmul.f32 %v1524_v41, %v796_v38  ;;  %v798_v36 = vpop.xlane.xlu1 %797  ;;  %v885_v62 = vsel %vm884_vm6, %v1518_v31, %v881_v48  ;;  %vm898_vm8 = vweird.f32 %v1524_v41 }
 0x413   :  { %v2369_v45 = vpop.eup %1525  ;;  %1527 = vrcp.f32 %v798_v36  ;;  %v890_v49 = vsel %vm887_vm7, %v889_v35, %v885_v62  ;;  %vm899_vm10 = vmor %vm897_vm9, %vm898_vm8  ;;  %v918_v37 = vand.u32 2147483648, %v798_v36  ;;  %v916_v53 = vand.u32 2147483647, %v798_v36 }
 0x414   :  { %v894_v11 = vsub.f32 1.0, %v893_v4  ;;  %807 = vadd.xlane.f32.xlu0 %v2369_v45  ;;  %v891_v40 = vmul.f32 %v2304_v12, %v890_v49  ;;  %1529 = vpow2.f32 %v781_v34  ;;  %vm912_vm13 = vweird.f32 %v798_v36 }
 0x415   :  { %v736_v44 = vpop.xlane.xlu0 %735  ;;  %v919_v6 = vor.u32 1.1754944e-38, %v918_v37  ;;  %vm917_vm15 = vcmp.eq.f32.partialorder %v916_v53, 8.507059e+37 }
 0x416   :  { %v895_v50 = vmul.f32 %v1524_v41, %v894_v11  ;;  %v752_v51 = vsub.f32 %v2334_v60, %v736_v44  ;;  %1133 = vmatmul.f32.gmra.mxu1 %v891_v40 }
 0x418   :  { %v783_v54 = vmul.f32 1.442695, %v752_v51  ;;  %v896_v55 = vadd.f32 %v1524_v41, %v895_v50 }
 0x419   :  { %v1528_v56 = vpop.eup %1527 }
 0x41a   :  { %v908_v7 = vmul.f32 %v1528_v56, %v798_v36  ;;  %1531 = vpow2.f32 %v783_v54  ;;  %v800_v57 = vpop.xlane.xlu1 %799  ;;  %v900_v61 = vsel %vm899_vm10, %v1524_v41, %v896_v55  ;;  %v2374_v12 = vpop.eup %1529  ;;  %vm913_vm12 = vweird.f32 %v1528_v56  ;;  %v1170_v41 = vld [vmem:[%s2508_s5] sm:$0xff] }
 0x41b   :  { %1533 = vrcp.f32 %v800_v57  ;;  %v905_v59 = vsel %vm902_vm11, %v904_v47, %v900_v61  ;;  %vm914_vm14 = vmor %vm912_vm13, %vm913_vm12  ;;  %v933_v23 = vand.u32 2147483648, %v800_v57  ;;  %v931_v19 = vand.u32 2147483647, %v800_v57  ;;  %1234 = vmatpush.msra.mxu2 %v1170_v41  ;;  %1441 = vmatpush.msrb.mxu3 %v1170_v41 }
 0x41c   :  { %v909_v17 = vsub.f32 1.0, %v908_v7  ;;  %813 = vadd.xlane.f32.xlu0 %v2374_v12  ;;  %v906_v60 = vmul.f32 %v2321_v10, %v905_v59  ;;  %vm927_vm3 = vweird.f32 %v800_v57 }
 0x41d   :  { %v934_v26 = vor.u32 1.1754944e-38, %v933_v23  ;;  %vm932_vm5 = vcmp.eq.f32.partialorder %v931_v19, 8.507059e+37 }
 0x41e   :  { %v910_v39 = vmul.f32 %v1528_v56, %v909_v17  ;;  %1136 = vmatmul.f32.gmra.mxu1 %v906_v60 }
 0x420   :  { %v2378_v9 = vpop.eup %1531  ;;  %v911_v3 = vadd.f32 %v1528_v56, %v910_v39 }
 0x421   :  { %v1534_v15 = vpop.eup %1533  ;;  %815 = vadd.xlane.f32.xlu2 %v2378_v9 }
 0x422   :  { %v923_v8 = vmul.f32 %v1534_v15, %v800_v57  ;;  %v802_v63 = vpop.xlane.xlu1 %801  ;;  %v915_v13 = vsel %vm914_vm14, %v1528_v56, %v911_v3  ;;  %vm928_vm2 = vweird.f32 %v1534_v15 }
 0x423   :  { %1535 = vrcp.f32 %v802_v63  ;;  %v920_v10 = vsel %vm917_vm15, %v919_v6, %v915_v13  ;;  %vm929_vm4 = vmor %vm927_vm3, %vm928_vm2  ;;  %v948_v28 = vand.u32 2147483648, %v802_v63  ;;  %vm942_vm7 = vweird.f32 %v802_v63 }
 0x424   :  { %v924_v14 = vsub.f32 1.0, %v923_v8  ;;  %v921_v16 = vmul.f32 %v2331_v43, %v920_v10  ;;  %v946_v43 = vand.u32 2147483647, %v802_v63 }
 0x425   :  { %v949_v42 = vor.u32 1.1754944e-38, %v948_v28 }
 0x426   :  { %v925_v18 = vmul.f32 %v1534_v15, %v924_v14  ;;  %1139 = vmatmul.f32.gmra.mxu1 %v921_v16  ;;  %vm947_vm9 = vcmp.eq.f32.partialorder %v946_v43, 8.507059e+37 }
 0x428   :  { %v926_v21 = vadd.f32 %v1534_v15, %v925_v18 }
 0x429   :  { %v1536_v24 = vpop.eup %1535 }
 0x42a   :  { %v938_v31 = vmul.f32 %v1536_v24, %v802_v63  ;;  %v930_v27 = vsel %vm929_vm4, %v1534_v15, %v926_v21  ;;  %vm943_vm6 = vweird.f32 %v1536_v24 }
 0x42b   :  { %v935_v32 = vsel %vm932_vm5, %v934_v26, %v930_v27  ;;  %vm944_vm8 = vmor %vm942_vm7, %vm943_vm6 }
 0x42c   :  { %v939_v38 = vsub.f32 1.0, %v938_v31  ;;  %v936_v2 = vmul.f32 %v2338_v5, %v935_v32 }
 0x42e   :  { %v940_v29 = vmul.f32 %v1536_v24, %v939_v38  ;;  %1142 = vmatmul.f32.gmra.mxu1 %v936_v2 }
 0x430   :  { %v941_v30 = vadd.f32 %v1536_v24, %v940_v29 }
 0x432   :  { %v945_v25 = vsel %vm944_vm8, %v1536_v24, %v941_v30 }
 0x433   :  { %v950_v33 = vsel %vm947_vm9, %v949_v42, %v945_v25 }
 0x434   :  { %v951_v48 = vmul.f32 %v2342_v0, %v950_v33  ;;  %v806_v0 = vpop.xlane.xlu1 %805 }
 0x435   :  { %1537 = vrcp.f32 %v806_v0  ;;  %v978_v37 = vand.u32 2147483648, %v806_v0  ;;  %vm972_vm15 = vweird.f32 %v806_v0  ;;  %v976_v3 = vand.u32 2147483647, %v806_v0 }
 0x436   :  { %1145 = vmatmul.f32.gmra.mxu1 %v951_v48 }
 0x437   :  { %v979_v13 = vor.u32 1.1754944e-38, %v978_v37  ;;  %vm977_vm3 = vcmp.eq.f32.partialorder %v976_v3, 8.507059e+37 }
 0x43b   :  { %v1538_v36 = vpop.eup %1537 }
 0x43c   :  { %v968_v49 = vmul.f32 %v1538_v36, %v806_v0  ;;  %vm973_vm14 = vweird.f32 %v1538_v36 }
 0x43d   :  { %vm974_vm2 = vmor %vm972_vm15, %vm973_vm14 }
 0x43e   :  { %v969_v40 = vsub.f32 1.0, %v968_v49 }
 0x440   :  { %v970_v51 = vmul.f32 %v1538_v36, %v969_v40 }
 0x442   :  { %v971_v59 = vadd.f32 %v1538_v36, %v970_v51 }
 0x444   :  { %v975_v8 = vsel %vm974_vm2, %v1538_v36, %v971_v59 }
 0x445   :  { %v980_v16 = vsel %vm977_vm3, %v979_v13, %v975_v8 }
 0x446   :  { %v981_v21 = vmul.f32 %v2345_v1, %v980_v16 }
 0x459   :  { %v1122_v5 = vpop.f32.mrf.mxu1 }
 0x45a   :  { %1417 = vmatmul.msk.f32.vlgmr.msra.gmra.mxu2 %vm575_vm1, %v1122_v5 }
 0x461   :  { %v1125_v34 = vpop.f32.mrf.mxu1 }
 0x462   :  { %1418 = vmatmul.msk.f32.gmra.mxu2 %vm575_vm1, %v1125_v34 }
 0x469   :  { %v1128_v35 = vpop.f32.mrf.mxu1 }
 0x46a   :  { %1419 = vmatmul.msk.f32.gmra.mxu2 %vm575_vm1, %v1128_v35 }
 0x471   :  { %v1131_v4 = vpop.f32.mrf.mxu1 }
 0x472   :  { %1420 = vmatmul.msk.f32.gmra.mxu2 %vm575_vm1, %v1131_v4 }
 0x47c   :  { %v804_v62 = vpop.xlane.xlu2 %803 }
 0x47d   :  { %1539 = vrcp.f32 %v804_v62  ;;  %v963_v54 = vand.u32 2147483648, %v804_v62  ;;  %v961_v56 = vand.u32 2147483647, %v804_v62  ;;  %vm957_vm11 = vweird.f32 %v804_v62 }
 0x47f   :  { %v964_v7 = vor.u32 1.1754944e-38, %v963_v54  ;;  %vm962_vm13 = vcmp.eq.f32.partialorder %v961_v56, 8.507059e+37 }
 0x483   :  { %v1540_v11 = vpop.eup %1539 }
 0x484   :  { %v953_v44 = vmul.f32 %v1540_v11, %v804_v62  ;;  %v2391_v46 = vpop.xlane.xlu2 %809  ;;  %vm958_vm10 = vweird.f32 %v1540_v11  ;;  %v2394_v57 = vpop.xlane.xlu1 %811 }
 0x485   :  { %1541 = vrcp.f32 %v2391_v46  ;;  %vm959_vm12 = vmor %vm957_vm11, %vm958_vm10  ;;  %v1008_v42 = vand.u32 2147483648, %v2391_v46  ;;  %vm1002_vm9 = vweird.f32 %v2391_v46  ;;  %v1006_v33 = vand.u32 2147483647, %v2391_v46 }
 0x486   :  { %v954_v50 = vsub.f32 1.0, %v953_v44  ;;  %v1023_v62 = vand.u32 2147483648, %v2394_v57  ;;  %v1021_v49 = vand.u32 2147483647, %v2394_v57 }
 0x487   :  { %v808_v52 = vpop.xlane.xlu0 %807  ;;  %v1009_v34 = vor.u32 1.1754944e-38, %v1008_v42  ;;  %vm1007_vm11 = vcmp.eq.f32.partialorder %v1006_v33, 8.507059e+37 }
 0x488   :  { %v955_v55 = vmul.f32 %v1540_v11, %v954_v50  ;;  %1543 = vrcp.f32 %v808_v52  ;;  %v993_v19 = vand.u32 2147483648, %v808_v52  ;;  %vm987_vm5 = vweird.f32 %v808_v52 }
 0x489   :  { %1545 = vrcp.f32 %v2394_v57  ;;  %v991_v26 = vand.u32 2147483647, %v808_v52  ;;  %v1024_v50 = vor.u32 1.1754944e-38, %v1023_v62  ;;  %vm1022_vm15 = vcmp.eq.f32.partialorder %v1021_v49, 8.507059e+37  ;;  %v1291_v62 = vld [vmem:[%s2509_s6 + $0x38] sm:$0xff] }
 0x48a   :  { %v956_v47 = vadd.f32 %v1540_v11, %v955_v55  ;;  %v994_v38 = vor.u32 1.1754944e-38, %v993_v19 }
 0x48b   :  { %v1542_v17 = vpop.eup %1541  ;;  %vm992_vm7 = vcmp.eq.f32.partialorder %v991_v26, 8.507059e+37 }
 0x48c   :  { %v960_v61 = vsel %vm959_vm12, %v1540_v11, %v956_v47  ;;  %v998_v6 = vmul.f32 %v1542_v17, %v2391_v46  ;;  %vm1003_vm8 = vweird.f32 %v1542_v17 }
 0x48d   :  { %v965_v60 = vsel %vm962_vm13, %v964_v7, %v960_v61  ;;  %vm1004_vm10 = vmor %vm1002_vm9, %vm1003_vm8  ;;  %vm1017_vm13 = vweird.f32 %v2394_v57 }
 0x48e   :  { %v1544_v39 = vpop.eup %1543  ;;  %v966_v53 = vmul.f32 %v2358_v22, %v965_v60  ;;  %v999_v23 = vsub.f32 1.0, %v998_v6 }
 0x48f   :  { %v983_v15 = vmul.f32 %v1544_v39, %v808_v52  ;;  %v2399_v18 = vpop.xlane.xlu0 %813  ;;  %vm988_vm4 = vweird.f32 %v1544_v39  ;;  %v1546_v22 = vpop.eup %1545 }
 0x490   :  { %1148 = vmatmul.f32.gmra.mxu1 %v966_v53  ;;  %1547 = vrcp.f32 %v2399_v18  ;;  %vm989_vm6 = vmor %vm987_vm5, %vm988_vm4  ;;  %v1000_v31 = vmul.f32 %v1542_v17, %v999_v23  ;;  %v1013_v27 = vmul.f32 %v1546_v22, %v2394_v57  ;;  %vm1018_vm12 = vweird.f32 %v1546_v22 }
 0x491   :  { %v984_v63 = vsub.f32 1.0, %v983_v15  ;;  %vm1019_vm14 = vmor %vm1017_vm13, %vm1018_vm12  ;;  %v1038_v56 = vand.u32 2147483648, %v2399_v18  ;;  %vm1032_vm3 = vweird.f32 %v2399_v18 }
 0x492   :  { %v1014_v29 = vsub.f32 1.0, %v1013_v27  ;;  %v1001_v1 = vadd.f32 %v1542_v17, %v1000_v31 }
 0x493   :  { %v985_v10 = vmul.f32 %v1544_v39, %v984_v63  ;;  %v1134_v14 = vpop.f32.mrf.mxu1  ;;  %v1039_v61 = vor.u32 1.1754944e-38, %v1038_v56  ;;  %v1286_v56 = vld [vmem:[%s2509_s6 + $0x10] sm:$0xff] }
 0x494   :  { %1421 = vmatmul.msk.f32.gmra.mxu2 %vm575_vm1, %v1134_v14  ;;  %v2405_v43 = vpop.xlane.xlu2 %815  ;;  %v1015_v48 = vmul.f32 %v1546_v22, %v1014_v29  ;;  %v1005_v5 = vsel %vm1004_vm10, %v1542_v17, %v1001_v1 }
 0x495   :  { %v986_v24 = vadd.f32 %v1544_v39, %v985_v10  ;;  %1549 = vrcp.f32 %v2405_v43  ;;  %v1010_v4 = vsel %vm1007_vm11, %v1009_v34, %v1005_v5  ;;  %v1053_v37 = vand.u32 2147483648, %v2405_v43  ;;  %v1294_v5 = vld [vmem:[%s2509_s6 + $0x50] sm:$0xff] }
 0x496   :  { %v1548_v30 = vpop.eup %1547  ;;  %v1016_v0 = vadd.f32 %v1546_v22, %v1015_v48  ;;  %v1011_v11 = vmul.f32 %v2363_v20, %v1010_v4  ;;  %v1036_v20 = vand.u32 2147483647, %v2399_v18  ;;  %v1295_v48 = vld [vmem:[%s2509_s6 + $0x58] sm:$0xff] }
 0x497   :  { %v990_v32 = vsel %vm989_vm6, %v1544_v39, %v986_v24  ;;  %v1028_v41 = vmul.f32 %v1548_v30, %v2399_v18  ;;  %vm1033_vm2 = vweird.f32 %v1548_v30  ;;  %v1051_v39 = vand.u32 2147483647, %v2405_v43 }
 0x498   :  { %1151 = vmatmul.f32.gmra.mxu1 %v981_v21  ;;  %v995_v28 = vsel %vm992_vm7, %v994_v38, %v990_v32  ;;  %v1020_v46 = vsel %vm1019_vm14, %v1546_v22, %v1016_v0  ;;  %vm1034_vm4 = vmor %vm1032_vm3, %vm1033_vm2  ;;  %vm1037_vm5 = vcmp.eq.f32.partialorder %v1036_v20, 8.507059e+37  ;;  %vm1047_vm7 = vweird.f32 %v2405_v43 }
 0x499   :  { %v996_v25 = vmul.f32 %v2369_v45, %v995_v28  ;;  %v1029_v36 = vsub.f32 1.0, %v1028_v41  ;;  %v1025_v52 = vsel %vm1022_vm15, %v1024_v50, %v1020_v46  ;;  %v1054_v3 = vor.u32 1.1754944e-38, %v1053_v37  ;;  %v1298_v28 = vld [vmem:[%s2509_s6 + $0x70] sm:$0xff]  ;;  %v1551_v37 = vld [vmem:[%s2503_s0] sm:$0xff] }
 0x49a   :  { %v1026_v47 = vmul.f32 %v2365_v58, %v1025_v52  ;;  %vm1052_vm9 = vcmp.eq.f32.partialorder %v1051_v39, 8.507059e+37  ;;  %v1318_v39 = vmul.f32 2.0, %v1551_v37 }
 0x49b   :  { %v1137_v2 = vpop.f32.mrf.mxu1  ;;  %v1550_v45 = vpop.eup %1549  ;;  %v1030_v40 = vmul.f32 %v1548_v30, %v1029_v36  ;;  %v1292_v36 = vld [vmem:[%s2509_s6 + $0x40] sm:$0xff] }
 0x49c   :  { %1422 = vmatmul.msk.f32.vlgmr.msrb.gmra.mxu3 %vm575_vm1, %v1137_v2  ;;  %v1043_v44 = vmul.f32 %v1550_v45, %v2405_v43  ;;  %vm1048_vm6 = vweird.f32 %v1550_v45  ;;  %v1299_v2 = vld [vmem:[%s2509_s6 + $0x78] sm:$0xff] }
 0x49d   :  { %v1031_v54 = vadd.f32 %v1548_v30, %v1030_v40  ;;  %vm1049_vm8 = vmor %vm1047_vm7, %vm1048_vm6 }
 0x49e   :  { %v1044_v55 = vsub.f32 1.0, %v1043_v44  ;;  %v1289_v44 = vld [vmem:[%s2509_s6 + $0x28] sm:$0xff] }
 0x49f   :  { %v1035_v57 = vsel %vm1034_vm4, %v1548_v30, %v1031_v54  ;;  %v1297_v30 = vld [vmem:[%s2509_s6 + $0x68] sm:$0xff]  ;;  %v1287_v54 = vld [vmem:[%s2509_s6 + $0x18] sm:$0xff] }
 0x4a0   :  { %1154 = vmatmul.f32.gmra.mxu1 %v996_v25  ;;  %v1045_v7 = vmul.f32 %v1550_v45, %v1044_v55  ;;  %v1040_v17 = vsel %vm1037_vm5, %v1039_v61, %v1035_v57  ;;  %v1296_v25 = vld [vmem:[%s2509_s6 + $0x60] sm:$0xff] }
 0x4a1   :  { %v1041_v58 = vmul.f32 %v2374_v12, %v1040_v17  ;;  %v1284_v57 = vld [vmem:[%s2509_s6] sm:$0xff] }
 0x4a2   :  { %v1046_v60 = vadd.f32 %v1550_v45, %v1045_v7  ;;  %v1316_v17 = vld [vmem:[%s2510_s7] sm:$0xff] }
 0x4a3   :  { %v1140_v35 = vpop.f32.mrf.mxu1 }
 0x4a4   :  { %1423 = vmatmul.msk.f32.gmra.mxu3 %vm575_vm1, %v1140_v35  ;;  %v1050_v53 = vsel %vm1049_vm8, %v1550_v45, %v1046_v60  ;;  %v1293_v35 = vld [vmem:[%s2509_s6 + $0x48] sm:$0xff] }
 0x4a5   :  { %v1055_v15 = vsel %vm1052_vm9, %v1054_v3, %v1050_v53  ;;  %v1317_v60 = vld [vmem:[%s2510_s7 + $0x8] sm:$0xff]  ;;  %s1351_s7 = sshll.u32 %s2511_s8, 4  ;;  %s1352_s7 = int_to_ptr.hbm [resolvable:$true] %s1351_s7 }
 0x4a6   :  { %v1056_v6 = vmul.f32 %v2378_v9, %v1055_v15  ;;  %v1552_v3 = vld [vmem:[%s2503_s0 + $0x8] sm:$0xff] }
 0x4a7   :  { %v1319_v15 = vmul.f32 2.0, %v1552_v3 }
 0x4a8   :  { %1157 = vmatmul.f32.gmra.mxu1 %v1011_v11  ;;  %v1290_v11 = vld [vmem:[%s2509_s6 + $0x30] sm:$0xff] }
 0x4ab   :  { %v1143_v51 = vpop.f32.mrf.mxu1 }
 0x4ac   :  { %1424 = vmatmul.msk.f32.gmra.mxu3 %vm575_vm1, %v1143_v51  ;;  %v1288_v51 = vld [vmem:[%s2509_s6 + $0x20] sm:$0xff] }
 0x4b0   :  { %1160 = vmatmul.f32.gmra.mxu1 %v1026_v47  ;;  %v1285_v47 = vld [vmem:[%s2509_s6 + $0x8] sm:$0xff] }
 0x4b3   :  { %v1146_v59 = vpop.f32.mrf.mxu1 }
 0x4b4   :  { %1425 = vmatmul.msk.f32.gmra.mxu3 %vm575_vm1, %v1146_v59 }
 0x4b8   :  { %1163 = vmatmul.f32.gmra.mxu1 %v1041_v58 }
 0x4c0   :  { %1166 = vmatmul.f32.gmra.mxu1 %v1056_v6 }
 0x4dd   :  { %v1236_v31 = vpop.f32.mrf.mxu2 }
 0x4de   :  { %v1300_v59 = vmul.f32 %v1284_v57, %v1236_v31 }
 0x4e5   :  { %v1239_v32 = vpop.f32.mrf.mxu2 }
 0x4e6   :  { %v1301_v61 = vmul.f32 %v1285_v47, %v1239_v32 }
 0x4ed   :  { %v1242_v1 = vpop.f32.mrf.mxu2 }
 0x4ee   :  { %v1302_v7 = vmul.f32 %v1286_v56, %v1242_v1 }
 0x4f5   :  { %v1245_v0 = vpop.f32.mrf.mxu2 }
 0x4f6   :  { %v1303_v20 = vmul.f32 %v1287_v54, %v1245_v0 }
 0x50d   :  { %v1149_v8 = vpop.f32.mrf.mxu1 }
 0x50e   :  { %1426 = vmatmul.msk.f32.gmra.mxu3 %vm575_vm1, %v1149_v8 }
 0x515   :  { %v1152_v63 = vpop.f32.mrf.mxu1 }
 0x516   :  { %1427 = vmatmul.msk.f32.gmra.mxu3 %vm575_vm1, %v1152_v63 }
 0x517   :  { %v1248_v50 = vpop.f32.mrf.mxu2 }
 0x518   :  { %v1304_v55 = vmul.f32 %v1288_v51, %v1248_v50 }
 0x51d   :  { %v1155_v13 = vpop.f32.mrf.mxu1 }
 0x51e   :  { %1428 = vmatmul.msk.f32.gmra.mxu3 %vm575_vm1, %v1155_v13 }
 0x51f   :  { %v1251_v16 = vpop.f32.mrf.mxu3 }
 0x520   :  { %v1305_v52 = vmul.f32 %v1289_v44, %v1251_v16 }
 0x525   :  { %v1158_v10 = vpop.f32.mrf.mxu1 }
 0x526   :  { %1429 = vmatmul.msk.f32.gmra.mxu3 %vm575_vm1, %v1158_v10 }
 0x527   :  { %v1254_v23 = vpop.f32.mrf.mxu3 }
 0x528   :  { %v1306_v46 = vmul.f32 %v1290_v11, %v1254_v23 }
 0x52d   :  { %v1161_v12 = vpop.f32.mrf.mxu1 }
 0x52e   :  { %1430 = vmatmul.msk.f32.gmra.mxu3 %vm575_vm1, %v1161_v12 }
 0x52f   :  { %v1257_v18 = vpop.f32.mrf.mxu3 }
 0x530   :  { %v1307_v40 = vmul.f32 %v1291_v62, %v1257_v18 }
 0x535   :  { %v1164_v14 = vpop.f32.mrf.mxu1 }
 0x536   :  { %1431 = vmatmul.msk.f32.gmra.mxu3 %vm575_vm1, %v1164_v14 }
 0x537   :  { %v1260_v22 = vpop.f32.mrf.mxu3 }
 0x538   :  { %v1308_v49 = vmul.f32 %v1292_v36, %v1260_v22 }
 0x53d   :  { %v1167_v9 = vpop.f32.mrf.mxu1 }
 0x53e   :  { %1432 = vmatmul.msk.f32.gmra.mxu3 %vm575_vm1, %v1167_v9 }
 0x591   :  { %v1263_v19 = vpop.f32.mrf.mxu3 }
 0x592   :  { %v1309_v45 = vmul.f32 %v1293_v35, %v1263_v19 }
 0x599   :  { %v1266_v21 = vpop.f32.mrf.mxu3 }
 0x59a   :  { %v1310_v4 = vmul.f32 %v1294_v5, %v1266_v21 }
 0x5a1   :  { %v1269_v24 = vpop.f32.mrf.mxu3 }
 0x5a2   :  { %v1311_v34 = vmul.f32 %v1295_v48, %v1269_v24 }
 0x5a9   :  { %v1272_v26 = vpop.f32.mrf.mxu3 }
 0x5aa   :  { %v1312_v41 = vmul.f32 %v1296_v25, %v1272_v26 }
 0x5b1   :  { %v1275_v27 = vpop.f32.mrf.mxu3 }
 0x5b2   :  { %v1313_v33 = vmul.f32 %v1297_v30, %v1275_v27 }
 0x5b9   :  { %v1278_v38 = vpop.f32.mrf.mxu3 }
 0x5ba   :  { %v1314_v42 = vmul.f32 %v1298_v28, %v1278_v38 }
 0x5c1   :  { %v1281_v29 = vpop.f32.mrf.mxu3 }
 0x5c2   :  { %v1315_v43 = vmul.f32 %v1299_v2, %v1281_v29 }
 0x5c4   :  { %1320 = vmatpush.msrb.mxu0 %v1315_v43 }
 0x5c6   :  { %1321 = vmatpush.msrb.mxu0 %v1314_v42 }
 0x5c8   :  { %1322 = vmatpush.msrb.mxu0 %v1313_v33 }
 0x5ca   :  { %1323 = vmatpush.msrb.mxu0 %v1312_v41 }
 0x5cc   :  { %1324 = vmatpush.msrb.mxu0 %v1311_v34 }
 0x5ce   :  { %1325 = vmatpush.msrb.mxu0 %v1310_v4 }
 0x5d0   :  { %1326 = vmatpush.msrb.mxu0 %v1309_v45 }
 0x5d2   :  { %1327 = vmatpush.msrb.mxu0 %v1308_v49 }
 0x5d4   :  { %1328 = vmatpush.msrb.mxu0 %v1307_v40 }
 0x5d6   :  { %1329 = vmatpush.msrb.mxu0 %v1306_v46 }
 0x5d8   :  { %1330 = vmatpush.msrb.mxu0 %v1305_v52 }
 0x5da   :  { %1331 = vmatpush.msrb.mxu0 %v1304_v55 }
 0x5dc   :  { %1332 = vmatpush.msrb.mxu0 %v1303_v20 }
 0x5de   :  { %1333 = vmatpush.msrb.mxu0 %v1302_v7 }
 0x5e0   :  { %1334 = vmatpush.msrb.mxu0 %v1301_v61 }
 0x5e2   :  { %1335 = vmatpush.msrb.mxu0 %v1300_v59 }
 0x5e3   :  { %1336 = vmatmul.f32.vlgmr.msrb.gmra.mxu0 %v1316_v17 }
 0x5eb   :  { %1339 = vmatmul.f32.gmra.mxu0 %v1317_v60 }
 0x660   :  { %v1337_v58 = vpop.f32.mrf.mxu0 }
 0x661   :  { %v1338_v53 = vadd.f32 %v1337_v58, %v1318_v39 }
 0x663   :  { %1343 = vst.msk [vmem:[#allocation2] sm:$0xff] %vm56_vm0, %v1338_v53 }
 0x668   :  { %v1340_v6 = vpop.f32.mrf.mxu0 }
 0x669   :  { %v1341_v8 = vadd.f32 %v1340_v6, %v1319_v15 }
 0x66b   :  { %1344 = vst.msk [vmem:[#allocation2 + $0x8] sm:$0xff] %vm56_vm0, %v1341_v8 }
 0x66c   :  { %1357 = dma.vmem_to_hbm [thread:$0]  %s1350_s1, 256, %s1352_s7, [#allocation3], %s1582_s2, %s1582_s2, %s1583_s23  }
 0x66d   :  { %1577 = dma.done.wait [#allocation3], 256  }
 0x66e   :  { %1578 = vsyncadd [#allocation3], 4294967040 }
 0x66f   :  { %1362 = vsyncpa [#allocation3], 1 }

</bundles_post_ra>
